<compile_context>
chip_gen: v7x
topology: tpu7x:2x2x1
jax: 0.10.0
libtpu: 0.0.40
codegen_flags: <defaults>
</compile_context>

<pallas_src>
import functools

import jax
import jax.numpy as jnp
from jax.experimental import pallas as pl
from jax.experimental.pallas import tpu as pltpu

_NEG_BIG = -1e30  # finite "minus infinity" for masked padded action lanes


def pg_policy_kernel(obs_ref, w1_ref, b1_ref, w2_ref, b2_ref, w3_ref, b3_ref,
                     tri_ref, u_ref, act_ref, logp_ref, *, n_actions):
    # --- MLP hot path: bf16 MXU inputs, f32 accumulation, f32 element-wise ---
    obs = obs_ref[...].astype(jnp.bfloat16)                                   # [TB, I]
    h1 = jnp.dot(obs, w1_ref[...], preferred_element_type=jnp.float32) + b1_ref[...]
    h1 = jnp.maximum(h1, 0.0)                                                 # [TB, Hp] f32
    h2 = jnp.dot(h1.astype(jnp.bfloat16), w2_ref[...],
                 preferred_element_type=jnp.float32) + b2_ref[...]
    h2 = jnp.maximum(h2, 0.0)                                                 # [TB, Hp] f32
    logits = jnp.dot(h2.astype(jnp.bfloat16), w3_ref[...],
                     preferred_element_type=jnp.float32) + b3_ref[...]        # [TB, Op] f32

    # Mask padded action lanes (weights/biases were zero-padded) before the softmax.
    lane = jax.lax.broadcasted_iota(jnp.int32, logits.shape, 1)               # [TB, Op]
    valid = lane < n_actions
    logits = jnp.where(valid, logits, _NEG_BIG)

    # --- numerically-stable softmax pieces (kept in f32) ---
    m = jnp.max(logits, axis=-1, keepdims=True)                               # [TB, 1]
    z = logits - m
    e = jnp.exp(z)                                                            # [TB, Op]
    s = jnp.sum(e, axis=-1, keepdims=True)                                    # [TB, 1]

    # --- inverse-CDF sampling on unnormalized exponentials (no reciprocal needed):
    #     inclusive cdf via a resident upper-triangular matmul, compare against u * s.
    cum = jnp.dot(e, tri_ref[...], preferred_element_type=jnp.float32)        # [TB, Op]
    u = u_ref[...]                                                            # [TB, 1] in [0,1)
    below = jnp.logical_and(valid, cum < u * s)
    action = jnp.sum(below.astype(jnp.int32), axis=-1, keepdims=True)         # [TB, 1] int32
    action = jnp.minimum(action, n_actions - 1)                               # clamp (u ~ 1.0 / fp)

    # --- exact log_prob at the sampled action: sum(onehot * z) - log(s) ---
    onehot = (lane == action).astype(jnp.float32)                             # [TB, Op]
    logp = jnp.sum(onehot * z, axis=-1, keepdims=True) - jnp.log(s)           # [TB, 1]

    act_ref[...] = action
    logp_ref[...] = logp


def _round_up(x, m):
    return ((x + m - 1) // m) * m


def _pad2(a, rows, cols):
    return jnp.pad(a, ((0, rows - a.shape[0]), (0, cols - a.shape[1])))


def prepare_policy(params):
    """One-time preparation (hoisted out of the per-call forward):
    pad feature dims to lane multiples of 128, cast weights to bf16 (f32 biases),
    and build the upper-triangular inclusive-CDF matrix."""
    w1, b1, w2, b2, w3, b3 = params
    I, H = w1.shape
    O = w3.shape[1]
    Hp = _round_up(H, 128)
    Op = _round_up(O, 128)

    prepped = {
        "w1": _pad2(w1, I, Hp).astype(jnp.bfloat16),      # obs contraction dim stays unpadded
        "b1": _pad2(b1, 1, Hp).astype(jnp.float32),
        "w2": _pad2(w2, Hp, Hp).astype(jnp.bfloat16),
        "b2": _pad2(b2, 1, Hp).astype(jnp.float32),
        "w3": _pad2(w3, Hp, Op).astype(jnp.bfloat16),
        "b3": _pad2(b3, 1, Op).astype(jnp.float32),
        "n_actions": O,
        "input_size": I,
    }
    row = jax.lax.broadcasted_iota(jnp.int32, (Op, Op), 0)
    col = jax.lax.broadcasted_iota(jnp.int32, (Op, Op), 1)
    prepped["tri"] = (row <= col).astype(jnp.float32)     # kept f32: exact CDF matmul
    return prepped


def pg_policy_forward(obs, prepped, u, *, tile_b=512):
    """obs: [B, I] f32; u: [B] (or [B,1]) f32 uniforms in [0, 1) (one per row).
    prepped: output of prepare_policy(). Returns (action [B] int32, log_prob [B] f32)."""
    B, I = obs.shape
    assert I == prepped["input_size"]
    O = prepped["n_actions"]
    Hp = prepped["w1"].shape[1]
    Op = prepped["w3"].shape[1]

    # Batch tile: large for amortization, shrunk for tiny batches, and split so the
    # grid has >= 2 steps when possible (lets the 2nd TensorCore work on v7x).
    tile_b = _round_up(tile_b, 128)
    TB = min(tile_b, _round_up(max(B, 8), 128))
    Bp = _round_up(B, TB)
    if Bp // TB == 1 and TB >= 256:
        TB //= 2
        Bp = _round_up(B, TB)

    obs_p = obs.astype(jnp.float32)
    if Bp != B:
        obs_p = jnp.pad(obs_p, ((0, Bp - B), (0, 0)))
    u_col = u.reshape(-1, 1).astype(jnp.float32)
    if Bp != B:
        u_col = jnp.pad(u_col, ((0, Bp - B), (0, 0)), constant_values=0.5)

    kernel = functools.partial(pg_policy_kernel, n_actions=O)

    action, log_prob = pl.pallas_call(
        kernel,
        out_shape=(jax.ShapeDtypeStruct((Bp, 1), jnp.int32),
                   jax.ShapeDtypeStruct((Bp, 1), jnp.float32)),
        grid=(Bp // TB,),
        in_specs=[
            pl.BlockSpec((TB, I), lambda i: (i, 0)),    # obs: unpadded lanes, tiled over batch
            pl.BlockSpec((I, Hp), lambda i: (0, 0)),    # w1 (bf16): resident
            pl.BlockSpec((1, Hp), lambda i: (0, 0)),    # b1: resident
            pl.BlockSpec((Hp, Hp), lambda i: (0, 0)),   # w2 (bf16): resident
            pl.BlockSpec((1, Hp), lambda i: (0, 0)),    # b2: resident
            pl.BlockSpec((Hp, Op), lambda i: (0, 0)),   # w3 (bf16): resident
            pl.BlockSpec((1, Op), lambda i: (0, 0)),    # b3: resident
            pl.BlockSpec((Op, Op), lambda i: (0, 0)),   # tri: resident
            pl.BlockSpec((TB, 1), lambda i: (i, 0)),    # u: tiled over batch
        ],
        out_specs=(pl.BlockSpec((TB, 1), lambda i: (i, 0)),   # action (int32)
                   pl.BlockSpec((TB, 1), lambda i: (i, 0))),  # log_prob (f32)
        compiler_params=pltpu.CompilerParams(
            dimension_semantics=("parallel",),          # megacore-shard batch tiles
            vmem_limit_bytes=32 * 1024 * 1024,
        ),
    )(obs_p, prepped["w1"], prepped["b1"], prepped["w2"], prepped["b2"],
      prepped["w3"], prepped["b3"], prepped["tri"], u_col)

    return action[:B, 0], log_prob[:B, 0]


def init_params(key, input_size, output_size, hidden_dim):
    """Deterministic synthetic init (PyTorch-like uniform fan-in scaling).
    Weights stored [in, out] (transposed vs torch Linear.weight), biases [1, out]."""
    keys = jax.random.split(key, 6)

    def lin(kw, kb, fan_in, fan_out):
        bound = 1.0 / jnp.sqrt(jnp.float32(fan_in))
        w = jax.random.uniform(kw, (fan_in, fan_out), jnp.float32, -bound, bound)
        b = jax.random.uniform(kb, (1, fan_out), jnp.float32, -bound, bound)
        return w, b

    w1, b1 = lin(keys[0], keys[1], input_size, hidden_dim)
    w2, b2 = lin(keys[2], keys[3], hidden_dim, hidden_dim)
    w3, b3 = lin(keys[4], keys[5], hidden_dim, output_size)
    return (w1, b1, w2, b2, w3, b3)


if __name__ == "__main__":
    input_size, hidden_dim, output_size = 16, 32, 8
    batch = 4

    key = jax.random.PRNGKey(0)
    k_param, k_obs, k_u = jax.random.split(key, 3)

    params = init_params(k_param, input_size, output_size, hidden_dim)
    prepped = prepare_policy(params)                       # one-time padding / casts / tri
    obs = jax.random.normal(k_obs, (batch, input_size), jnp.float32)
    # TODO(synk): torch Categorical's internal RNG has no Pallas equivalent; sampling
    # randomness is supplied explicitly as one uniform in [0,1) per row.
    u = jax.random.uniform(k_u, (batch,), jnp.float32)

    action, log_prob = pg_policy_forward(obs, prepped, u)
    jax.block_until_ready((action, log_prob))

    # Pure-JAX reference with the SAME bf16-input / f32-accumulate matmul path.
    w1, b1, w2, b2, w3, b3 = params

    def bdot(x, w):
        return jnp.dot(x.astype(jnp.bfloat16), w.astype(jnp.bfloat16),
                       preferred_element_type=jnp.float32)

    h1 = jnp.maximum(bdot(obs, w1) + b1, 0.0)
    h2 = jnp.maximum(bdot(h1, w2) + b2, 0.0)
    logits_ref = bdot(h2, w3) + b3
    logp_all_ref = jax.nn.log_softmax(logits_ref, axis=-1)
    logp_at_action_ref = jnp.take_along_axis(logp_all_ref, action[:, None], axis=-1)[:, 0]

    # Sampling check: u must lie in the sampled action's CDF bucket (inverse-CDF semantics).
    probs_ref = jax.nn.softmax(logits_ref, axis=-1)
    cdf_ref = jnp.cumsum(probs_ref, axis=-1)
    hi = jnp.take_along_axis(cdf_ref, action[:, None], axis=-1)[:, 0]
    lo = jnp.where(action > 0,
                   jnp.take_along_axis(cdf_ref, jnp.maximum(action - 1, 0)[:, None], axis=-1)[:, 0],
                   0.0)

    assert action.shape == (batch,) and action.dtype == jnp.int32
    assert log_prob.shape == (batch,) and log_prob.dtype == jnp.float32
    assert bool(jnp.all((action >= 0) & (action < output_size)))
    assert bool(jnp.all(jnp.isfinite(log_prob))) and bool(jnp.all(log_prob <= 1e-5))
    assert bool(jnp.allclose(log_prob, logp_at_action_ref, atol=5e-4, rtol=1e-3))
    assert bool(jnp.all((u >= lo - 1e-4) & (u <= hi + 1e-4)))

    print("KERNEL_OK")
</pallas_src>

<mosaic_0001>
module attributes {stable_mosaic.version = 11 : i64} {
  func.func @pg_policy_kernel(%arg0: i32, %arg1: memref<128x16xf32, #tpu.memory_space<vmem>>, %arg2: memref<16x128xbf16, #tpu.memory_space<vmem>>, %arg3: memref<1x128xf32, #tpu.memory_space<vmem>>, %arg4: memref<128x128xbf16, #tpu.memory_space<vmem>>, %arg5: memref<1x128xf32, #tpu.memory_space<vmem>>, %arg6: memref<128x128xbf16, #tpu.memory_space<vmem>>, %arg7: memref<1x128xf32, #tpu.memory_space<vmem>>, %arg8: memref<128x128xf32, #tpu.memory_space<vmem>>, %arg9: memref<128x1xf32, #tpu.memory_space<vmem>>, %arg10: memref<128x1xi32, #tpu.memory_space<vmem>>, %arg11: memref<128x1xf32, #tpu.memory_space<vmem>>) attributes {dimension_semantics = [#tpu.dimension_semantics<parallel>], iteration_bounds = array<i64: 1>, scalar_prefetch = 0 : i64, scratch_operands = 0 : i64, tpu.core_type = #tpu.core_type<tc>, window_params = [{transform_indices = @transform_0, window_bounds = array<i64: 128, 16>}, {pipeline_mode = #tpu.pipeline_mode<synchronous>, transform_indices = @transform_1, window_bounds = array<i64: 16, 128>}, {pipeline_mode = #tpu.pipeline_mode<synchronous>, transform_indices = @transform_2, window_bounds = array<i64: 1, 128>}, {pipeline_mode = #tpu.pipeline_mode<synchronous>, transform_indices = @transform_3, window_bounds = array<i64: 128, 128>}, {pipeline_mode = #tpu.pipeline_mode<synchronous>, transform_indices = @transform_4, window_bounds = array<i64: 1, 128>}, {pipeline_mode = #tpu.pipeline_mode<synchronous>, transform_indices = @transform_5, window_bounds = array<i64: 128, 128>}, {pipeline_mode = #tpu.pipeline_mode<synchronous>, transform_indices = @transform_6, window_bounds = array<i64: 1, 128>}, {pipeline_mode = #tpu.pipeline_mode<synchronous>, transform_indices = @transform_7, window_bounds = array<i64: 128, 128>}, {transform_indices = @transform_8, window_bounds = array<i64: 128, 1>}, {transform_indices = @transform_9, window_bounds = array<i64: 128, 1>}, {transform_indices = @transform_10, window_bounds = array<i64: 128, 1>}]} {
    %c0 = arith.constant 0 : index
    %c0_0 = arith.constant 0 : index
    %0 = vector.load %arg1[%c0, %c0_0] : memref<128x16xf32, #tpu.memory_space<vmem>>, vector<128x16xf32>
    %1 = arith.truncf %0 : vector<128x16xf32> to vector<128x16xbf16>
    %c0_1 = arith.constant 0 : index
    %c0_2 = arith.constant 0 : index
    %2 = vector.load %arg2[%c0_1, %c0_2] : memref<16x128xbf16, #tpu.memory_space<vmem>>, vector<16x128xbf16>
    %cst = arith.constant dense<0.000000e+00> : vector<128x128xf32>
    %3 = tpu.matmul %1, %2, %cst {dimension_numbers = #tpu.dot_dimension_numbers<[1], [0], [0], [1], [0, 0, 1, 1], [], []>} : vector<128x16xbf16>, vector<16x128xbf16>, vector<128x128xf32> -> vector<128x128xf32>
    %c0_3 = arith.constant 0 : index
    %c0_4 = arith.constant 0 : index
    %4 = vector.load %arg3[%c0_3, %c0_4] : memref<1x128xf32, #tpu.memory_space<vmem>>, vector<1x128xf32>
    %5 = vector.broadcast %4 : vector<1x128xf32> to vector<128x128xf32>
    %6 = arith.addf %3, %5 : vector<128x128xf32>
    %cst_5 = arith.constant 0.000000e+00 : f32
    %7 = vector.broadcast %cst_5 : f32 to vector<128x128xf32>
    %8 = arith.maximumf %6, %7 : vector<128x128xf32>
    %9 = arith.truncf %8 : vector<128x128xf32> to vector<128x128xbf16>
    %c0_6 = arith.constant 0 : index
    %c0_7 = arith.constant 0 : index
    %10 = vector.load %arg4[%c0_6, %c0_7] : memref<128x128xbf16, #tpu.memory_space<vmem>>, vector<128x128xbf16>
    %cst_8 = arith.constant dense<0.000000e+00> : vector<128x128xf32>
    %11 = tpu.matmul %9, %10, %cst_8 {dimension_numbers = #tpu.dot_dimension_numbers<[1], [0], [0], [1], [0, 0, 1, 1], [], []>} : vector<128x128xbf16>, vector<128x128xbf16>, vector<128x128xf32> -> vector<128x128xf32>
    %c0_9 = arith.constant 0 : index
    %c0_10 = arith.constant 0 : index
    %12 = vector.load %arg5[%c0_9, %c0_10] : memref<1x128xf32, #tpu.memory_space<vmem>>, vector<1x128xf32>
    %13 = vector.broadcast %12 : vector<1x128xf32> to vector<128x128xf32>
    %14 = arith.addf %11, %13 : vector<128x128xf32>
    %cst_11 = arith.constant 0.000000e+00 : f32
    %15 = vector.broadcast %cst_11 : f32 to vector<128x128xf32>
    %16 = arith.maximumf %14, %15 : vector<128x128xf32>
    %17 = arith.truncf %16 : vector<128x128xf32> to vector<128x128xbf16>
    %c0_12 = arith.constant 0 : index
    %c0_13 = arith.constant 0 : index
    %18 = vector.load %arg6[%c0_12, %c0_13] : memref<128x128xbf16, #tpu.memory_space<vmem>>, vector<128x128xbf16>
    %cst_14 = arith.constant dense<0.000000e+00> : vector<128x128xf32>
    %19 = tpu.matmul %17, %18, %cst_14 {dimension_numbers = #tpu.dot_dimension_numbers<[1], [0], [0], [1], [0, 0, 1, 1], [], []>} : vector<128x128xbf16>, vector<128x128xbf16>, vector<128x128xf32> -> vector<128x128xf32>
    %c0_15 = arith.constant 0 : index
    %c0_16 = arith.constant 0 : index
    %20 = vector.load %arg7[%c0_15, %c0_16] : memref<1x128xf32, #tpu.memory_space<vmem>>, vector<1x128xf32>
    %21 = vector.broadcast %20 : vector<1x128xf32> to vector<128x128xf32>
    %22 = arith.addf %19, %21 : vector<128x128xf32>
    %23 = tpu.iota {dimensions = array<i32: 1>} : vector<128x128xi32>
    %c8_i32 = arith.constant 8 : i32
    %24 = vector.broadcast %c8_i32 : i32 to vector<128x128xi32>
    %25 = arith.cmpi slt, %23, %24 : vector<128x128xi32>
    %cst_17 = arith.constant -1.000000e+30 : f32
    %26 = vector.broadcast %cst_17 : f32 to vector<128x128xf32>
    %27 = arith.select %25, %22, %26 : vector<128x128xi1>, vector<128x128xf32>
    %cst_18 = arith.constant dense<0xFF800000> : vector<128xf32>
    %28 = vector.multi_reduction <maximumf>, %27, %cst_18 [1] : vector<128x128xf32> to vector<128xf32>
    %29 = vector.shape_cast %28 : vector<128xf32> to vector<128x1xf32>
    %30 = vector.broadcast %29 : vector<128x1xf32> to vector<128x128xf32>
    %31 = arith.subf %27, %30 : vector<128x128xf32>
    %32 = math.exp %31 : vector<128x128xf32>
    %cst_19 = arith.constant dense<0.000000e+00> : vector<128xf32>
    %33 = vector.multi_reduction <add>, %32, %cst_19 [1] : vector<128x128xf32> to vector<128xf32>
    %34 = vector.shape_cast %33 : vector<128xf32> to vector<128x1xf32>
    %c0_20 = arith.constant 0 : index
    %c0_21 = arith.constant 0 : index
    %35 = vector.load %arg8[%c0_20, %c0_21] : memref<128x128xf32, #tpu.memory_space<vmem>>, vector<128x128xf32>
    %cst_22 = arith.constant dense<0.000000e+00> : vector<128x128xf32>
    %36 = tpu.matmul %32, %35, %cst_22 {dimension_numbers = #tpu.dot_dimension_numbers<[1], [0], [0], [1], [0, 0, 1, 1], [], []>} : vector<128x128xf32>, vector<128x128xf32>, vector<128x128xf32> -> vector<128x128xf32>
    %c0_23 = arith.constant 0 : index
    %c0_24 = arith.constant 0 : index
    %37 = vector.load %arg9[%c0_23, %c0_24] : memref<128x1xf32, #tpu.memory_space<vmem>>, vector<128x1xf32>
    %38 = arith.mulf %37, %34 : vector<128x1xf32>
    %39 = vector.broadcast %38 : vector<128x1xf32> to vector<128x128xf32>
    %40 = arith.cmpf olt, %36, %39 : vector<128x128xf32>
    %41 = arith.andi %25, %40 : vector<128x128xi1>
    %42 = arith.extui %41 : vector<128x128xi1> to vector<128x128xi32>
    %cst_25 = arith.constant dense<0> : vector<128xi32>
    %43 = vector.multi_reduction <add>, %42, %cst_25 [1] : vector<128x128xi32> to vector<128xi32>
    %44 = vector.shape_cast %43 : vector<128xi32> to vector<128x1xi32>
    %c7_i32 = arith.constant 7 : i32
    %45 = vector.broadcast %c7_i32 : i32 to vector<128x1xi32>
    %46 = arith.minsi %44, %45 : vector<128x1xi32>
    %47 = vector.broadcast %46 : vector<128x1xi32> to vector<128x128xi32>
    %48 = arith.cmpi eq, %23, %47 : vector<128x128xi32>
    %49 = arith.extui %48 : vector<128x128xi1> to vector<128x128xi32>
    %50 = arith.sitofp %49 : vector<128x128xi32> to vector<128x128xf32>
    %51 = arith.mulf %50, %31 : vector<128x128xf32>
    %cst_26 = arith.constant dense<0.000000e+00> : vector<128xf32>
    %52 = vector.multi_reduction <add>, %51, %cst_26 [1] : vector<128x128xf32> to vector<128xf32>
    %53 = vector.shape_cast %52 : vector<128xf32> to vector<128x1xf32>
    %54 = math.log %34 : vector<128x1xf32>
    %55 = arith.subf %53, %54 : vector<128x1xf32>
    %c0_27 = arith.constant 0 : index
    %c0_28 = arith.constant 0 : index
    %56 = vector.load %arg10[%c0_27, %c0_28] : memref<128x1xi32, #tpu.memory_space<vmem>>, vector<128x1xi32>
    tpu.vector_store %arg10[%c0_27, %c0_28], %46 {strides = array<i32>} : memref<128x1xi32, #tpu.memory_space<vmem>>, vector<128x1xi32>,
    %c0_29 = arith.constant 0 : index
    %c0_30 = arith.constant 0 : index
    %57 = vector.load %arg11[%c0_29, %c0_30] : memref<128x1xf32, #tpu.memory_space<vmem>>, vector<128x1xf32>
    tpu.vector_store %arg11[%c0_29, %c0_30], %55 {strides = array<i32>} : memref<128x1xf32, #tpu.memory_space<vmem>>, vector<128x1xf32>,
    return
  }
  func.func @transform_0(%arg0: i32) -> (i32, i32) {
    %c0_i32 = arith.constant 0 : i32
    %c0_i32_0 = arith.constant 0 : i32
    return %arg0, %c0_i32 : i32, i32
  }
  func.func @transform_1(%arg0: i32) -> (i32, i32) {
    %c0_i32 = arith.constant 0 : i32
    %c0_i32_0 = arith.constant 0 : i32
    %c0_i32_1 = arith.constant 0 : i32
    return %c0_i32, %c0_i32_0 : i32, i32
  }
  func.func @transform_2(%arg0: i32) -> (i32, i32) {
    %c0_i32 = arith.constant 0 : i32
    %c0_i32_0 = arith.constant 0 : i32
    %c0_i32_1 = arith.constant 0 : i32
    return %c0_i32, %c0_i32_0 : i32, i32
  }
  func.func @transform_3(%arg0: i32) -> (i32, i32) {
    %c0_i32 = arith.constant 0 : i32
    %c0_i32_0 = arith.constant 0 : i32
    %c0_i32_1 = arith.constant 0 : i32
    return %c0_i32, %c0_i32_0 : i32, i32
  }
  func.func @transform_4(%arg0: i32) -> (i32, i32) {
    %c0_i32 = arith.constant 0 : i32
    %c0_i32_0 = arith.constant 0 : i32
    %c0_i32_1 = arith.constant 0 : i32
    return %c0_i32, %c0_i32_0 : i32, i32
  }
  func.func @transform_5(%arg0: i32) -> (i32, i32) {
    %c0_i32 = arith.constant 0 : i32
    %c0_i32_0 = arith.constant 0 : i32
    %c0_i32_1 = arith.constant 0 : i32
    return %c0_i32, %c0_i32_0 : i32, i32
  }
  func.func @transform_6(%arg0: i32) -> (i32, i32) {
    %c0_i32 = arith.constant 0 : i32
    %c0_i32_0 = arith.constant 0 : i32
    %c0_i32_1 = arith.constant 0 : i32
    return %c0_i32, %c0_i32_0 : i32, i32
  }
  func.func @transform_7(%arg0: i32) -> (i32, i32) {
    %c0_i32 = arith.constant 0 : i32
    %c0_i32_0 = arith.constant 0 : i32
    %c0_i32_1 = arith.constant 0 : i32
    return %c0_i32, %c0_i32_0 : i32, i32
  }
  func.func @transform_8(%arg0: i32) -> (i32, i32) {
    %c0_i32 = arith.constant 0 : i32
    %c0_i32_0 = arith.constant 0 : i32
    return %arg0, %c0_i32 : i32, i32
  }
  func.func @transform_9(%arg0: i32) -> (i32, i32) {
    %c0_i32 = arith.constant 0 : i32
    %c0_i32_0 = arith.constant 0 : i32
    return %arg0, %c0_i32 : i32, i32
  }
  func.func @transform_10(%arg0: i32) -> (i32, i32) {
    %c0_i32 = arith.constant 0 : i32
    %c0_i32_0 = arith.constant 0 : i32
    return %arg0, %c0_i32 : i32, i32
  }
}

</mosaic_0001>

<bundles_post_ra>
// kernel: tpu_custom_call.1
= control target key start
LH: loop header
LB: loop body
LE: loop exit
PB: predicated region body
PF: predicated region fallthrough
CT: control target
= control target key end

     0   :  { %vm74_vm0 = vcmask 130048   ;;  %s2580_s1 = inlined_call_operand.vmem [shape: bf16[16,128], index: 1, kind: input, shape index: {}]   ;;  %s2581_s0 = inlined_call_operand.vmem [shape: f32[128,16], index: 0, kind: input, shape index: {}]   ;;  %s2582_s3 = inlined_call_operand.vmem [shape: bf16[128,128], index: 3, kind: input, shape index: {}]   ;;  %s2583_s5 = inlined_call_operand.vmem [shape: bf16[128,128], index: 5, kind: input, shape index: {}]   ;;  %s2584_s2 = inlined_call_operand.vmem [shape: f32[1,128], index: 2, kind: input, shape index: {}]   ;;  %s2585_s4 = inlined_call_operand.vmem [shape: f32[1,128], index: 4, kind: input, shape index: {}]   ;;  %s2586_s7 = inlined_call_operand.vmem [shape: f32[128,128], index: 7, kind: input, shape index: {}]   ;;  %s2587_s6 = inlined_call_operand.vmem [shape: f32[1,128], index: 6, kind: input, shape index: {}]   ;;  %s2588_s8 = inlined_call_operand.vmem [shape: f32[128,1], index: 8, kind: input, shape index: {}]   ;;  %s2589_s9 = inlined_call_operand.vmem [shape: s32[128,1], index: 9, kind: output, shape index: {0}]   ;;  %s2590_s10 = inlined_call_operand.vmem [shape: f32[128,1], index: 10, kind: output, shape index: {1}]  }
   0x1   :  { %v1748_v0 = vld [vmem:[%s2580_s1] sm:$0xff]   ;;  %v36_v2 = vld [vmem:[%s2581_s0 + $0x8] sm:$0xff]  ;;  %v37_v3 = vld [vmem:[%s2581_s0 + $0x10] sm:$0xff] }
   0x2   :  { %v35_v1 = vld [vmem:[%s2581_s0] sm:$0xff]  ;;  %1558 = vmatprep.subr.bf16.mxu0 %v1748_v0  ;;  %v38_v5 = vld [vmem:[%s2581_s0 + $0x18] sm:$0xff]  ;;  %v40_v7 = vld [vmem:[%s2581_s0 + $0x28] sm:$0xff] }
   0x3   :  { %v51_v4 = vpack.c.bf16 %v36_v2, %v35_v1  ;;  %v39_v6 = vld [vmem:[%s2581_s0 + $0x20] sm:$0xff]  ;;  %1559 = vmatpush3.bf16.msra.mxu0 %v1748_v0  ;;  %v52_v8 = vpack.c.bf16 %v38_v5, %v37_v3  ;;  %v41_v10 = vld [vmem:[%s2581_s0 + $0x30] sm:$0xff]  ;;  %v42_v11 = vld [vmem:[%s2581_s0 + $0x38] sm:$0xff] }
   0x4   :  { %v53_v9 = vpack.c.bf16 %v40_v7, %v39_v6  ;;  %v43_v12 = vld [vmem:[%s2581_s0 + $0x40] sm:$0xff]  ;;  %v44_v13 = vld [vmem:[%s2581_s0 + $0x48] sm:$0xff]  ;;  %v54_v16 = vpack.c.bf16 %v42_v11, %v41_v10  ;;  %v1751_v18 = vld [vmem:[%s2582_s3 + $0x10] sm:$0xff]  }
   0x5   :  { %1560 = vmatprep.mubr.msk.bf16.mxu0 %vm74_vm0, %v51_v4  ;;  %v1749_v14 = vld [vmem:[%s2582_s3] sm:$0xff]   ;;  %v1750_v15 = vld [vmem:[%s2582_s3 + $0x8] sm:$0xff]   ;;  %v55_v17 = vpack.c.bf16 %v44_v13, %v43_v12  ;;  %v45_v19 = vld [vmem:[%s2581_s0 + $0x50] sm:$0xff] }
   0x6   :  { %1561 = vmatmul.mubr.msk.bf16.vlgmr.msra.gmra.mrb[0].mxu0 %vm74_vm0, %v52_v8  ;;  %1576 = vmatprep.subr.bf16.mxu1 %v1749_v14  ;;  %v46_v20 = vld [vmem:[%s2581_s0 + $0x58] sm:$0xff]  ;;  %v47_v22 = vld [vmem:[%s2581_s0 + $0x60] sm:$0xff]  ;;  %v48_v23 = vld [vmem:[%s2581_s0 + $0x68] sm:$0xff] }
   0x7   :  { %1564 = vmatprep.mubr.msk.bf16.mxu0 %vm74_vm0, %v53_v9  ;;  %1577 = vmatpush3.bf16.msra.mxu1 %v1749_v14  ;;  %v1752_v21 = vld [vmem:[%s2582_s3 + $0x18] sm:$0xff]   ;;  %v56_v24 = vpack.c.bf16 %v46_v20, %v45_v19  ;;  %v57_v25 = vpack.c.bf16 %v48_v23, %v47_v22  ;;  %v1753_v26 = vld [vmem:[%s2582_s3 + $0x20] sm:$0xff]   ;;  %v49_v27 = vld [vmem:[%s2581_s0 + $0x70] sm:$0xff] }
   0x8   :  { %1578 = vmatprep.subr.bf16.mxu1 %v1750_v15  ;;  %v50_v28 = vld [vmem:[%s2581_s0 + $0x78] sm:$0xff]  ;;  %v1754_v29 = vld [vmem:[%s2582_s3 + $0x28] sm:$0xff]   ;;  %v1755_v31 = vld [vmem:[%s2582_s3 + $0x30] sm:$0xff]  }
   0x9   :  { %v58_v30 = vpack.c.bf16 %v50_v28, %v49_v27  ;;  %v1756_v32 = vld [vmem:[%s2582_s3 + $0x38] sm:$0xff]   ;;  %v1757_v33 = vld [vmem:[%s2583_s5] sm:$0xff]   ;;  %v1758_v34 = vld [vmem:[%s2583_s5 + $0x8] sm:$0xff]  }
   0xa   :  { %1608 = vmatprep.subr.bf16.mxu0 %v1757_v33  ;;  %v1759_v35 = vld [vmem:[%s2583_s5 + $0x10] sm:$0xff]   ;;  %v1760_v36 = vld [vmem:[%s2583_s5 + $0x18] sm:$0xff]   ;;  %v1761_v37 = vld [vmem:[%s2583_s5 + $0x20] sm:$0xff]  }
   0xb   :  { %1579 = vmatpush3.bf16.msra.mxu1 %v1750_v15  ;;  %1609 = vmatpush3.bf16.msra.mxu0 %v1757_v33  ;;  %v1762_v38 = vld [vmem:[%s2583_s5 + $0x28] sm:$0xff]   ;;  %v1441_v39 = vld [vmem:[%s2584_s2] ss:$0 sm:$0xff]  ;;  %v1764_v33 = vld [vmem:[%s2583_s5 + $0x38] sm:$0xff]  }
   0xc   :  { %1580 = vmatprep.subr.bf16.mxu1 %v1751_v18  ;;  %1610 = vmatprep.subr.bf16.mxu0 %v1758_v34 }
   0xe   :  { %1565 = vmatmul.mubr.msk.bf16.gmra.mrb[4].mxu0 %vm74_vm0, %v54_v16 }
   0xf   :  { %1568 = vmatprep.mubr.msk.bf16.mxu0 %vm74_vm0, %v55_v17  ;;  %1581 = vmatpush3.bf16.msra.mxu1 %v1751_v18 }
  0x10   :  { %1582 = vmatprep.subr.bf16.mxu1 %v1752_v21  ;;  %1611 = vmatpush3.bf16.msra.mxu0 %v1758_v34  ;;  %v1451_v34 = vld [vmem:[%s2585_s4] ss:$0 sm:$0xff] }
  0x11   :  { %1612 = vmatprep.subr.bf16.mxu0 %v1759_v35 }
  0x13   :  { %1583 = vmatpush3.bf16.msra.mxu1 %v1752_v21 }
  0x14   :  { %1584 = vmatprep.subr.bf16.mxu1 %v1753_v26  ;;  %1613 = vmatpush3.bf16.msra.mxu0 %v1759_v35 }
  0x15   :  { %1614 = vmatprep.subr.bf16.mxu0 %v1760_v36 }
  0x16   :  { %1569 = vmatmul.mubr.msk.bf16.gmra.mrb[8].mxu0 %vm74_vm0, %v56_v24 }
  0x17   :  { %1572 = vmatprep.mubr.msk.bf16.mxu0 %vm74_vm0, %v57_v25  ;;  %1585 = vmatpush3.bf16.msra.mxu1 %v1753_v26 }
  0x18   :  { %1586 = vmatprep.subr.bf16.mxu1 %v1754_v29  ;;  %1615 = vmatpush3.bf16.msra.mxu0 %v1760_v36 }
  0x19   :  { %1616 = vmatprep.subr.bf16.mxu0 %v1761_v37 }
  0x1b   :  { %1587 = vmatpush3.bf16.msra.mxu1 %v1754_v29 }
  0x1c   :  { %1588 = vmatprep.subr.bf16.mxu1 %v1755_v31  ;;  %1617 = vmatpush3.bf16.msra.mxu0 %v1761_v37 }
  0x1d   :  { %1618 = vmatprep.subr.bf16.mxu0 %v1762_v38 }
  0x1e   :  { %1573 = vmatmul.mubr.msk.bf16.gmra.mrb[12].mxu0 %vm74_vm0, %v58_v30 }
  0x1f   :  { %1589 = vmatpush3.bf16.msra.mxu1 %v1755_v31 }
  0x20   :  { %1590 = vmatprep.subr.bf16.mxu1 %v1756_v32  ;;  %1619 = vmatpush3.bf16.msra.mxu0 %v1762_v38 }
  0x23   :  { %1591 = vmatpush3.bf16.msra.mxu1 %v1756_v32  ;;  %v1763_v32 = vld [vmem:[%s2583_s5 + $0x30] sm:$0xff]  }
  0x24   :  { %1620 = vmatprep.subr.bf16.mxu0 %v1763_v32 }
  0x25   :  { %1621 = vmatpush3.bf16.msra.mxu0 %v1763_v32 }
  0x26   :  { %1622 = vmatprep.subr.bf16.mxu0 %v1764_v33 }
  0x29   :  { %1623 = vmatpush3.bf16.msra.mxu0 %v1764_v33  ;;  %v715_v33 = vld [vmem:[%s2586_s7 + $0x20] sm:$0xff] }
  0xd9   :  { %v1562_v40 = vpop.f32.mrb[0].mxu0 }
  0xda   :  { %v142_v41 = vadd.f32 %v1562_v40, %v1441_v39  ;;  %v133_v42 = vpop.f32.mrb[1].mxu0 }
  0xdb   :  { %v134_v43 = vadd.f32 %v1441_v39, %v133_v42  ;;  %v1563_v44 = vpop.f32.mrb[2].mxu0 }
  0xdc   :  { %v145_v45 = vadd.f32 %v1563_v44, %v1441_v39  ;;  %v136_v46 = vpop.f32.mrb[3].mxu0  ;;  %v198_v48 = vmax.f32 %v142_v41, 0.0 }
  0xdd   :  { %v137_v47 = vadd.f32 %v1441_v39, %v136_v46  ;;  %v196_v50 = vmax.f32 %v134_v43, 0.0 }
  0xde   :  { %v199_v49 = vmax.f32 %v145_v45, 0.0 }
  0xdf   :  { %v197_v51 = vmax.f32 %v137_v47, 0.0 }
  0xe0   :  { %v213_v52 = vpack.c.bf16 %v199_v49, %v198_v48 }
  0xe1   :  { %v1566_v53 = vpop.f32.mrb[4].mxu0  ;;  %v212_v54 = vpack.c.bf16 %v197_v51, %v196_v50 }
  0xe2   :  { %v158_v55 = vadd.f32 %v1566_v53, %v1441_v39  ;;  %v149_v56 = vpop.f32.mrb[5].mxu0 }
  0xe3   :  { %v150_v57 = vadd.f32 %v1441_v39, %v149_v56  ;;  %v1567_v58 = vpop.f32.mrb[6].mxu0  ;;  %1592 = vmatprep.mubr.bf16.mxu1 %v212_v54 }
  0xe4   :  { %v202_v59 = vmax.f32 %v158_v55, 0.0  ;;  %v161_v60 = vadd.f32 %v1567_v58, %v1441_v39  ;;  %v152_v61 = vpop.f32.mrb[7].mxu0  ;;  %1593 = vmatmul.mubr.bf16.vlgmr.msra.gmra.mrb[0].mxu1 %v213_v52 }
  0xe5   :  { %v153_v62 = vadd.f32 %v1441_v39, %v152_v61  ;;  %v200_v0 = vmax.f32 %v150_v57, 0.0 }
  0xe6   :  { %v203_v63 = vmax.f32 %v161_v60, 0.0 }
  0xe7   :  { %v201_v1 = vmax.f32 %v153_v62, 0.0 }
  0xe8   :  { %v215_v2 = vpack.c.bf16 %v203_v63, %v202_v59 }
  0xe9   :  { %v214_v3 = vpack.c.bf16 %v201_v1, %v200_v0  ;;  %v1570_v4 = vpop.f32.mrb[8].mxu0 }
  0xea   :  { %v174_v5 = vadd.f32 %v1570_v4, %v1441_v39  ;;  %v165_v6 = vpop.f32.mrb[9].mxu0 }
  0xeb   :  { %v166_v7 = vadd.f32 %v1441_v39, %v165_v6  ;;  %v1571_v8 = vpop.f32.mrb[10].mxu0  ;;  %1596 = vmatprep.mubr.bf16.mxu1 %v214_v3 }
  0xec   :  { %v206_v9 = vmax.f32 %v174_v5, 0.0  ;;  %v177_v10 = vadd.f32 %v1571_v8, %v1441_v39  ;;  %v168_v11 = vpop.f32.mrb[11].mxu0  ;;  %1597 = vmatmul.mubr.bf16.gmra.mrb[4].mxu1 %v215_v2 }
  0xed   :  { %v204_v12 = vmax.f32 %v166_v7, 0.0  ;;  %v169_v13 = vadd.f32 %v1441_v39, %v168_v11 }
  0xee   :  { %v207_v14 = vmax.f32 %v177_v10, 0.0 }
  0xef   :  { %v205_v15 = vmax.f32 %v169_v13, 0.0 }
  0xf0   :  { %v217_v16 = vpack.c.bf16 %v207_v14, %v206_v9 }
  0xf1   :  { %v216_v17 = vpack.c.bf16 %v205_v15, %v204_v12  ;;  %v1574_v18 = vpop.f32.mrb[12].mxu0 }
  0xf2   :  { %v190_v19 = vadd.f32 %v1574_v18, %v1441_v39  ;;  %v181_v20 = vpop.f32.mrb[13].mxu0 }
  0xf3   :  { %1600 = vmatprep.mubr.bf16.mxu1 %v216_v17  ;;  %v182_v21 = vadd.f32 %v1441_v39, %v181_v20  ;;  %v1575_v22 = vpop.f32.mrb[14].mxu0 }
  0xf4   :  { %1601 = vmatmul.mubr.bf16.gmra.mrb[8].mxu1 %v217_v16  ;;  %v210_v23 = vmax.f32 %v190_v19, 0.0  ;;  %v193_v24 = vadd.f32 %v1575_v22, %v1441_v39  ;;  %v184_v25 = vpop.f32.mrb[15].mxu0 }
  0xf5   :  { %v208_v26 = vmax.f32 %v182_v21, 0.0  ;;  %v185_v27 = vadd.f32 %v1441_v39, %v184_v25 }
  0xf6   :  { %v211_v28 = vmax.f32 %v193_v24, 0.0 }
  0xf7   :  { %v209_v29 = vmax.f32 %v185_v27, 0.0  ;;  %v711_v27 = vld [vmem:[%s2586_s7] sm:$0xff] }
  0xf8   :  { %v219_v30 = vpack.c.bf16 %v211_v28, %v210_v23  ;;  %v712_v28 = vld [vmem:[%s2586_s7 + $0x8] sm:$0xff] }
  0xf9   :  { %v218_v31 = vpack.c.bf16 %v209_v29, %v208_v26  ;;  %v713_v29 = vld [vmem:[%s2586_s7 + $0x10] sm:$0xff] }
  0xfb   :  { %1604 = vmatprep.mubr.bf16.mxu1 %v218_v31  ;;  %v714_v31 = vld [vmem:[%s2586_s7 + $0x18] sm:$0xff] }
  0xfc   :  { %1605 = vmatmul.mubr.bf16.gmra.mrb[12].mxu1 %v219_v30  ;;  %v1696_v30 = vpack.c.bf16 %v712_v28, %v711_v27  ;;  %v1700_v32 = vpack.c.bf16 %v714_v31, %v713_v29  ;;  %v725_v27 = vld [vmem:[%s2586_s7 + $0x70] sm:$0xff]  ;;  %v726_v28 = vld [vmem:[%s2586_s7 + $0x78] sm:$0xff] }
  0xfe   :  { %1697 = vmatprep.subr.bf16.mxu0 %v1696_v30  ;;  %1728 = vmatprep.subr.bf16.mxu1 %v1696_v30 }
  0xff   :  { %1736 = vmatpush3.bf16.msra.mxu1 %v1696_v30 }
 0x100   :  { %1729 = vmatprep.subr.bf16.mxu1 %v1700_v32 }
 0x103   :  { %1737 = vmatpush3.bf16.msra.mxu1 %v1700_v32 }
 0x1b7   :  { %v1594_v35 = vpop.f32.mrb[0].mxu1 }
 0x1b8   :  { %v334_v36 = vadd.f32 %v1594_v35, %v1451_v34  ;;  %v325_v37 = vpop.f32.mrb[1].mxu1 }
 0x1b9   :  { %v326_v38 = vadd.f32 %v1451_v34, %v325_v37  ;;  %v1595_v39 = vpop.f32.mrb[2].mxu1  ;;  %v718_v37 = vld [vmem:[%s2586_s7 + $0x38] sm:$0xff] }
 0x1ba   :  { %v337_v40 = vadd.f32 %v1595_v39, %v1451_v34  ;;  %v328_v41 = vpop.f32.mrb[3].mxu1  ;;  %v390_v43 = vmax.f32 %v334_v36, 0.0  ;;  %v717_v36 = vld [vmem:[%s2586_s7 + $0x30] sm:$0xff]  ;;  %v580_v39 = vlaneseq }
 0x1bb   :  { %v329_v42 = vadd.f32 %v1451_v34, %v328_v41  ;;  %v388_v45 = vmax.f32 %v326_v38, 0.0  ;;  %v1708_v38 = vpack.c.bf16 %v718_v37, %v717_v36  ;;  %v2028_v41 = vld [vmem:[%s2587_s6] ss:$0 sm:$0xff] }
 0x1bc   :  { %v391_v44 = vmax.f32 %v337_v40, 0.0  ;;  %v2023_v40 = vand.u32 127, %v580_v39 }
 0x1bd   :  { %v389_v46 = vmax.f32 %v329_v42, 0.0 }
 0x1be   :  { %v405_v47 = vpack.c.bf16 %v391_v44, %v390_v43  ;;  %vm582_vm1 = vcmp.lt.s32.totalorder %v2023_v40, 8 }
 0x1bf   :  { %v404_v48 = vpack.c.bf16 %v389_v46, %v388_v45  ;;  %v1598_v49 = vpop.f32.mrb[4].mxu1 }
 0x1c0   :  { %v350_v50 = vadd.f32 %v1598_v49, %v1451_v34  ;;  %v341_v51 = vpop.f32.mrb[5].mxu1 }
 0x1c1   :  { %v342_v52 = vadd.f32 %v1451_v34, %v341_v51  ;;  %v1599_v53 = vpop.f32.mrb[6].mxu1  ;;  %1624 = vmatprep.mubr.bf16.mxu0 %v404_v48 }
 0x1c2   :  { %v353_v54 = vadd.f32 %v1599_v53, %v1451_v34  ;;  %v344_v55 = vpop.f32.mrb[7].mxu1  ;;  %1625 = vmatmul.mubr.bf16.vlgmr.msra.gmra.mrb[16].mxu0 %v405_v47  ;;  %v394_v57 = vmax.f32 %v350_v50, 0.0 }
 0x1c3   :  { %v345_v56 = vadd.f32 %v1451_v34, %v344_v55  ;;  %v392_v59 = vmax.f32 %v342_v52, 0.0  ;;  %1699 = vmatpush3.bf16.msra.mxu0 %v1696_v30  ;;  %v1724_v30 = vpack.c.bf16 %v726_v28, %v725_v27 }
 0x1c4   :  { %v395_v58 = vmax.f32 %v353_v54, 0.0  ;;  %1701 = vmatprep.subr.bf16.mxu0 %v1700_v32 }
 0x1c5   :  { %v393_v60 = vmax.f32 %v345_v56, 0.0 }
 0x1c6   :  { %v407_v61 = vpack.c.bf16 %v395_v58, %v394_v57 }
 0x1c7   :  { %v406_v62 = vpack.c.bf16 %v393_v60, %v392_v59  ;;  %v1602_v63 = vpop.f32.mrb[8].mxu1  ;;  %1703 = vmatpush3.bf16.msra.mxu0 %v1700_v32 }
 0x1c8   :  { %v366_v0 = vadd.f32 %v1602_v63, %v1451_v34  ;;  %v357_v1 = vpop.f32.mrb[9].mxu1 }
 0x1c9   :  { %v358_v2 = vadd.f32 %v1451_v34, %v357_v1  ;;  %v1603_v3 = vpop.f32.mrb[10].mxu1  ;;  %1628 = vmatprep.mubr.bf16.mxu0 %v406_v62 }
 0x1ca   :  { %v398_v4 = vmax.f32 %v366_v0, 0.0  ;;  %v369_v5 = vadd.f32 %v1603_v3, %v1451_v34  ;;  %v360_v6 = vpop.f32.mrb[11].mxu1  ;;  %1629 = vmatmul.mubr.bf16.gmra.mrb[20].mxu0 %v407_v61  ;;  %v720_v3 = vld [vmem:[%s2586_s7 + $0x48] sm:$0xff] }
 0x1cb   :  { %v396_v7 = vmax.f32 %v358_v2, 0.0  ;;  %v361_v8 = vadd.f32 %v1451_v34, %v360_v6  ;;  %v719_v2 = vld [vmem:[%s2586_s7 + $0x40] sm:$0xff] }
 0x1cc   :  { %v399_v9 = vmax.f32 %v369_v5, 0.0  ;;  %v1712_v6 = vpack.c.bf16 %v720_v3, %v719_v2 }
 0x1cd   :  { %v397_v10 = vmax.f32 %v361_v8, 0.0 }
 0x1ce   :  { %v409_v11 = vpack.c.bf16 %v399_v9, %v398_v4  ;;  %v721_v9 = vld [vmem:[%s2586_s7 + $0x50] sm:$0xff] }
 0x1cf   :  { %v408_v12 = vpack.c.bf16 %v397_v10, %v396_v7  ;;  %v1606_v13 = vpop.f32.mrb[12].mxu1  ;;  %v722_v10 = vld [vmem:[%s2586_s7 + $0x58] sm:$0xff] }
 0x1d0   :  { %v382_v14 = vadd.f32 %v1606_v13, %v1451_v34  ;;  %v373_v15 = vpop.f32.mrb[13].mxu1 }
 0x1d1   :  { %1632 = vmatprep.mubr.bf16.mxu0 %v408_v12  ;;  %v374_v16 = vadd.f32 %v1451_v34, %v373_v15  ;;  %v1607_v17 = vpop.f32.mrb[14].mxu1 }
 0x1d2   :  { %1633 = vmatmul.mubr.bf16.gmra.mrb[24].mxu0 %v409_v11  ;;  %v402_v18 = vmax.f32 %v382_v14, 0.0  ;;  %v385_v19 = vadd.f32 %v1607_v17, %v1451_v34  ;;  %v376_v20 = vpop.f32.mrb[15].mxu1  ;;  %v1716_v14 = vpack.c.bf16 %v722_v10, %v721_v9 }
 0x1d3   :  { %v400_v21 = vmax.f32 %v374_v16, 0.0  ;;  %v377_v22 = vadd.f32 %v1451_v34, %v376_v20  ;;  %v716_v34 = vld [vmem:[%s2586_s7 + $0x28] sm:$0xff]  ;;  %v723_v20 = vld [vmem:[%s2586_s7 + $0x60] sm:$0xff] }
 0x1d4   :  { %v403_v23 = vmax.f32 %v385_v19, 0.0  ;;  %v1704_v35 = vpack.c.bf16 %v716_v34, %v715_v33 }
 0x1d5   :  { %v401_v24 = vmax.f32 %v377_v22, 0.0 }
 0x1d6   :  { %v411_v25 = vpack.c.bf16 %v403_v23, %v402_v18  ;;  %1705 = vmatprep.subr.bf16.mxu0 %v1704_v35  ;;  %1730 = vmatprep.subr.bf16.mxu1 %v1704_v35 }
 0x1d7   :  { %v410_v26 = vpack.c.bf16 %v401_v24, %v400_v21  ;;  %1707 = vmatpush3.bf16.msra.mxu0 %v1704_v35  ;;  %1738 = vmatpush3.bf16.msra.mxu1 %v1704_v35  ;;  %v724_v21 = vld [vmem:[%s2586_s7 + $0x68] sm:$0xff] }
 0x1d8   :  { %1709 = vmatprep.subr.bf16.mxu0 %v1708_v38  ;;  %1731 = vmatprep.subr.bf16.mxu1 %v1708_v38  ;;  %v1720_v24 = vpack.c.bf16 %v724_v21, %v723_v20 }
 0x1d9   :  { %1636 = vmatprep.mubr.bf16.mxu0 %v410_v26 }
 0x1da   :  { %1637 = vmatmul.mubr.bf16.gmra.mrb[28].mxu0 %v411_v25 }
 0x1db   :  { %1711 = vmatpush3.bf16.msra.mxu0 %v1708_v38  ;;  %1739 = vmatpush3.bf16.msra.mxu1 %v1708_v38 }
 0x1dc   :  { %1713 = vmatprep.subr.bf16.mxu0 %v1712_v6  ;;  %1732 = vmatprep.subr.bf16.mxu1 %v1712_v6 }
 0x1df   :  { %1715 = vmatpush3.bf16.msra.mxu0 %v1712_v6  ;;  %1740 = vmatpush3.bf16.msra.mxu1 %v1712_v6 }
 0x1e0   :  { %1717 = vmatprep.subr.bf16.mxu0 %v1716_v14  ;;  %1733 = vmatprep.subr.bf16.mxu1 %v1716_v14 }
 0x1e3   :  { %1719 = vmatpush3.bf16.msra.mxu0 %v1716_v14  ;;  %1741 = vmatpush3.bf16.msra.mxu1 %v1716_v14 }
 0x1e4   :  { %1721 = vmatprep.subr.bf16.mxu0 %v1720_v24  ;;  %1734 = vmatprep.subr.bf16.mxu1 %v1720_v24 }
 0x1e7   :  { %1723 = vmatpush3.bf16.msra.mxu0 %v1720_v24  ;;  %1742 = vmatpush3.bf16.msra.mxu1 %v1720_v24 }
 0x1e8   :  { %1725 = vmatprep.subr.bf16.mxu0 %v1724_v30  ;;  %1735 = vmatprep.subr.bf16.mxu1 %v1724_v30 }
 0x1eb   :  { %1727 = vmatpush3.bf16.msra.mxu0 %v1724_v30  ;;  %1743 = vmatpush3.bf16.msra.mxu1 %v1724_v30 }
 0x295   :  { %v1626_v42 = vpop.f32.mrb[16].mxu0 }
 0x296   :  { %v517_v43 = vpop.f32.mrb[17].mxu0  ;;  %v526_v57 = vadd.f32 %v1626_v42, %v2028_v41 }
 0x297   :  { %v518_v44 = vadd.f32 %v2028_v41, %v517_v43  ;;  %v1627_v45 = vpop.f32.mrb[18].mxu0 }
 0x298   :  { %v520_v46 = vpop.f32.mrb[19].mxu0  ;;  %v529_v4 = vadd.f32 %v1627_v45, %v2028_v41  ;;  %v2072_v5 = vsel %vm582_vm1, %v526_v57, -1e+30 }
 0x299   :  { %v521_v47 = vadd.f32 %v2028_v41, %v520_v46  ;;  %v2035_v48 = vsel %vm582_vm1, %v518_v44, -1e+30 }
 0x29a   :  { %599 = vmax.xlane.f32.xlu0 %v2035_v48  ;;  %v2090_v12 = vsel %vm582_vm1, %v529_v4, -1e+30 }
 0x29b   :  { %v2040_v50 = vsel %vm582_vm1, %v521_v47, -1e+30 }
 0x29d   :  { %v1630_v49 = vpop.f32.mrb[20].mxu0 }
 0x29e   :  { %v542_v51 = vadd.f32 %v1630_v49, %v2028_v41  ;;  %v533_v52 = vpop.f32.mrb[21].mxu0  ;;  %601 = vmax.xlane.f32.xlu0 %v2040_v50 }
 0x29f   :  { %v1631_v53 = vpop.f32.mrb[22].mxu0  ;;  %v534_v11 = vadd.f32 %v2028_v41, %v533_v52 }
 0x2a0   :  { %v536_v54 = vpop.f32.mrb[23].mxu0  ;;  %v2046_v55 = vsel %vm582_vm1, %v542_v51, -1e+30  ;;  %v545_v56 = vadd.f32 %v1631_v53, %v2028_v41 }
 0x2a1   :  { %v537_v22 = vadd.f32 %v2028_v41, %v536_v54  ;;  %v2108_v23 = vsel %vm582_vm1, %v534_v11, -1e+30 }
 0x2a2   :  { %611 = vmax.xlane.f32.xlu0 %v2046_v55  ;;  %v2053_v59 = vsel %vm582_vm1, %v545_v56, -1e+30 }
 0x2a3   :  { %v2125_v29 = vsel %vm582_vm1, %v537_v22, -1e+30 }
 0x2a5   :  { %v1634_v58 = vpop.f32.mrb[24].mxu0 }
 0x2a6   :  { %v558_v60 = vadd.f32 %v1634_v58, %v2028_v41  ;;  %613 = vmax.xlane.f32.xlu0 %v2053_v59  ;;  %v549_v61 = vpop.f32.mrb[25].mxu0 }
 0x2a7   :  { %v550_v62 = vadd.f32 %v2028_v41, %v549_v61  ;;  %v1635_v63 = vpop.f32.mrb[26].mxu0 }
 0x2a8   :  { %v2060_v0 = vsel %vm582_vm1, %v558_v60, -1e+30  ;;  %v552_v1 = vpop.f32.mrb[27].mxu0  ;;  %v561_v7 = vadd.f32 %v1635_v63, %v2028_v41 }
 0x2a9   :  { %619 = vmax.xlane.f32.xlu1 %v2060_v0  ;;  %v2078_v8 = vsel %vm582_vm1, %v550_v62, -1e+30  ;;  %v553_v15 = vadd.f32 %v2028_v41, %v552_v1 }
 0x2aa   :  { %603 = vmax.xlane.f32.xlu0 %v2072_v5  ;;  %v2096_v16 = vsel %vm582_vm1, %v561_v7, -1e+30 }
 0x2ab   :  { %v2114_v26 = vsel %vm582_vm1, %v553_v15, -1e+30 }
 0x2ad   :  { %615 = vmax.xlane.f32.xlu1 %v2078_v8  ;;  %v1638_v13 = vpop.f32.mrb[28].mxu0 }
 0x2ae   :  { %605 = vmax.xlane.f32.xlu0 %v2090_v12  ;;  %v565_v17 = vpop.f32.mrb[29].mxu0  ;;  %v574_v25 = vadd.f32 %v1638_v13, %v2028_v41 }
 0x2af   :  { %v1639_v18 = vpop.f32.mrb[30].mxu0  ;;  %v566_v31 = vadd.f32 %v2028_v41, %v565_v17 }
 0x2b0   :  { %v568_v19 = vpop.f32.mrb[31].mxu0  ;;  %v2131_v32 = vsel %vm582_vm1, %v574_v25, -1e+30  ;;  %v577_v35 = vadd.f32 %v1639_v18, %v2028_v41 }
 0x2b1   :  { %621 = vmax.xlane.f32.xlu1 %v2096_v16  ;;  %v569_v33 = vadd.f32 %v2028_v41, %v568_v19  ;;  %v2137_v34 = vsel %vm582_vm1, %v566_v31, -1e+30 }
 0x2b2   :  { %607 = vmax.xlane.f32.xlu0 %v2108_v23  ;;  %v2148_v37 = vsel %vm582_vm1, %v577_v35, -1e+30  ;;  %v1829_v35 = vmov 0  }
 0x2b3   :  { %v2143_v36 = vsel %vm582_vm1, %v569_v33, -1e+30  ;;  %1746 = vset.pattern.permute.xlu1 %v1829_v35  ;;  %1747 = vset.pattern.permute.xlu0 %v1829_v35 }
 0x2b5   :  { %617 = vmax.xlane.f32.xlu1 %v2114_v26 }
 0x2b6   :  { %609 = vmax.xlane.f32.xlu0 %v2125_v29 }
 0x2b9   :  { %627 = vmax.xlane.f32.xlu1 %v2131_v32 }
 0x2bd   :  { %623 = vmax.xlane.f32.xlu1 %v2137_v34 }
 0x2c1   :  { %625 = vmax.xlane.f32.xlu1 %v2143_v36 }
 0x2c5   :  { %629 = vmax.xlane.f32.xlu1 %v2148_v37 }
 0x327   :  { %v600_v38 = vpop.xlane.xlu0 %599 }
 0x328   :  { %v2152_v39 = vsub.f32 %v2035_v48, %v600_v38 }
 0x32a   :  { %v647_v42 = vmul.f32 1.442695, %v2152_v39 }
 0x32b   :  { %v602_v43 = vpop.xlane.xlu0 %601 }
 0x32c   :  { %1765 = vpow2.f32 %v647_v42  ;;  %v2156_v41 = vsub.f32 %v2040_v50, %v602_v43  ;;  %v874_v43 = vld [vmem:[%s2588_s8 + $0x10] sm:$0xff] }
 0x32e   :  { %v649_v44 = vmul.f32 1.442695, %v2156_v41 }
 0x32f   :  { %v612_v45 = vpop.xlane.xlu0 %611 }
 0x330   :  { %1767 = vpow2.f32 %v649_v44  ;;  %v2160_v46 = vsub.f32 %v2046_v55, %v612_v45 }
 0x332   :  { %v659_v47 = vmul.f32 1.442695, %v2160_v46 }
 0x333   :  { %v614_v49 = vpop.xlane.xlu0 %613 }
 0x334   :  { %1769 = vpow2.f32 %v659_v47  ;;  %v2164_v48 = vsub.f32 %v2053_v59, %v614_v49  ;;  %v875_v47 = vld [vmem:[%s2588_s8 + $0x18] sm:$0xff]  ;;  %v872_v49 = vld [vmem:[%s2588_s8] sm:$0xff] }
 0x336   :  { %v1766_v51 = vpop.eup %1765  ;;  %v661_v52 = vmul.f32 1.442695, %v2164_v48  ;;  %v620_v53 = vpop.xlane.xlu1 %619 }
 0x337   :  { %1672 = vmatprep.mubr.f32.mxu0 %v1766_v51  ;;  %v604_v50 = vpop.xlane.xlu0 %603  ;;  %v2179_v63 = vsub.f32 %v2060_v0, %v620_v53 }
 0x338   :  { %1771 = vpow2.f32 %v661_v52  ;;  %v2168_v54 = vsub.f32 %v2072_v5, %v604_v50 }
 0x339   :  { %v667_v6 = vmul.f32 1.442695, %v2179_v63 }
 0x33a   :  { %v1768_v56 = vpop.eup %1767  ;;  %v651_v55 = vmul.f32 1.442695, %v2168_v54  ;;  %v616_v57 = vpop.xlane.xlu1 %615 }
 0x33b   :  { %v2172_v58 = vsub.f32 %v2078_v8, %v616_v57  ;;  %1673 = vmatmul.mubr.f32.vlgmr.msra.gmra.mrb[32].mxu0 %v1768_v56  ;;  %v606_v59 = vpop.xlane.xlu0 %605 }
 0x33c   :  { %1773 = vpow2.f32 %v651_v55  ;;  %v2175_v60 = vsub.f32 %v2090_v12, %v606_v59 }
 0x33d   :  { %v663_v61 = vmul.f32 1.442695, %v2172_v58 }
 0x33e   :  { %v1770_v62 = vpop.eup %1769  ;;  %v653_v1 = vmul.f32 1.442695, %v2175_v60  ;;  %v622_v2 = vpop.xlane.xlu1 %621 }
 0x33f   :  { %1775 = vpow2.f32 %v663_v61  ;;  %1681 = vmatprep.mubr.f32.mxu1 %v1770_v62  ;;  %v608_v3 = vpop.xlane.xlu0 %607  ;;  %v2188_v9 = vsub.f32 %v2096_v16, %v622_v2  ;;  %v878_v61 = vld [vmem:[%s2588_s8 + $0x30] sm:$0xff]  ;;  %v876_v2 = vld [vmem:[%s2588_s8 + $0x20] sm:$0xff] }
 0x340   :  { %1777 = vpow2.f32 %v653_v1  ;;  %v2183_v4 = vsub.f32 %v2108_v23, %v608_v3 }
 0x341   :  { %v669_v17 = vmul.f32 1.442695, %v2188_v9 }
 0x342   :  { %v1772_v5 = vpop.eup %1771  ;;  %v655_v7 = vmul.f32 1.442695, %v2183_v4  ;;  %v618_v8 = vpop.xlane.xlu1 %617 }
 0x343   :  { %v2191_v0 = vsub.f32 %v2114_v26, %v618_v8  ;;  %1682 = vmatmul.mubr.f32.vlgmr.msra.gmra.mrb[16].mxu1 %v1772_v5  ;;  %v610_v10 = vpop.xlane.xlu0 %609  ;;  %v883_v8 = vld [vmem:[%s2588_s8 + $0x58] sm:$0xff] }
 0x344   :  { %1779 = vpow2.f32 %v655_v7  ;;  %v2194_v11 = vsub.f32 %v2125_v29, %v610_v10  ;;  %v879_v7 = vld [vmem:[%s2588_s8 + $0x38] sm:$0xff] }
 0x345   :  { %v665_v12 = vmul.f32 1.442695, %v2191_v0  ;;  %1781 = vpow2.f32 %v667_v6 }
 0x346   :  { %v1774_v13 = vpop.eup %1773  ;;  %v657_v14 = vmul.f32 1.442695, %v2194_v11  ;;  %v628_v15 = vpop.xlane.xlu1 %627 }
 0x347   :  { %1783 = vpow2.f32 %v665_v12  ;;  %683 = vadd.xlane.f32.xlu0 %v1774_v13  ;;  %1675 = vmatprep.mubr.f32.mxu0 %v1774_v13  ;;  %v2203_v21 = vsub.f32 %v2131_v32, %v628_v15  ;;  %v877_v15 = vld [vmem:[%s2588_s8 + $0x28] sm:$0xff] }
 0x348   :  { %1785 = vpow2.f32 %v657_v14 }
 0x349   :  { %v1776_v16 = vpop.eup %1775  ;;  %1787 = vpow2.f32 %v669_v17  ;;  %v675_v27 = vmul.f32 1.442695, %v2203_v21  ;;  %v881_v17 = vld [vmem:[%s2588_s8 + $0x48] sm:$0xff] }
 0x34a   :  { %v1778_v18 = vpop.eup %1777  ;;  %v624_v19 = vpop.xlane.xlu1 %623  ;;  %1684 = vmatprep.mubr.f32.mxu1 %v1776_v16 }
 0x34b   :  { %v2200_v20 = vsub.f32 %v2137_v34, %v624_v19  ;;  %679 = vadd.xlane.f32.xlu0 %v1766_v51  ;;  %685 = vadd.xlane.f32.xlu1 %v1778_v18 }
 0x34c   :  { %1676 = vmatmul.mubr.f32.gmra.mrb[34].mxu0 %v1778_v18 }
 0x34d   :  { %v671_v22 = vmul.f32 1.442695, %v2200_v20 }
 0x34e   :  { %v1780_v23 = vpop.eup %1779  ;;  %v626_v24 = vpop.xlane.xlu1 %625 }
 0x34f   :  { %1789 = vpow2.f32 %v671_v22  ;;  %v2207_v25 = vsub.f32 %v2143_v36, %v626_v24  ;;  %691 = vadd.xlane.f32.xlu0 %v1770_v62  ;;  %681 = vadd.xlane.f32.xlu1 %v1768_v56  ;;  %v1782_v26 = vpop.eup %1781  ;;  %v873_v56 = vld [vmem:[%s2588_s8 + $0x8] sm:$0xff]  ;;  %v882_v22 = vld [vmem:[%s2588_s8 + $0x50] sm:$0xff]  ;;  %v887_v24 = vld [vmem:[%s2588_s8 + $0x78] sm:$0xff] }
 0x350   :  { %1678 = vmatprep.mubr.f32.mxu0 %v1780_v23 }
 0x351   :  { %v1784_v28 = vpop.eup %1783  ;;  %v673_v29 = vmul.f32 1.442695, %v2207_v25 }
 0x352   :  { %v1786_v30 = vpop.eup %1785  ;;  %v630_v31 = vpop.xlane.xlu1 %629  ;;  %1685 = vmatmul.mubr.f32.gmra.mrb[18].mxu1 %v1784_v28 }
 0x353   :  { %1791 = vpow2.f32 %v673_v29  ;;  %v2212_v32 = vsub.f32 %v2148_v37, %v630_v31  ;;  %1687 = vmatprep.mubr.f32.mxu1 %v1782_v26  ;;  %693 = vadd.xlane.f32.xlu1 %v1772_v5  ;;  %v1788_v33 = vpop.eup %1787  ;;  %v880_v29 = vld [vmem:[%s2588_s8 + $0x40] sm:$0xff] }
 0x354   :  { %1793 = vpow2.f32 %v675_v27  ;;  %687 = vadd.xlane.f32.xlu0 %v1780_v23  ;;  %1679 = vmatmul.mubr.f32.gmra.mrb[36].mxu0 %v1786_v30 }
 0x355   :  { %v677_v34 = vmul.f32 1.442695, %v2212_v32 }
 0x356   :  { %1688 = vmatmul.mubr.f32.gmra.mrb[20].mxu1 %v1788_v33 }
 0x357   :  { %1795 = vpow2.f32 %v677_v34  ;;  %689 = vadd.xlane.f32.xlu1 %v1786_v30  ;;  %v885_v30 = vld [vmem:[%s2588_s8 + $0x68] sm:$0xff] }
 0x358   :  { %699 = vadd.xlane.f32.xlu0 %v1782_v26 }
 0x359   :  { %v1790_v36 = vpop.eup %1789 }
 0x35a   :  { %1690 = vmatprep.mubr.f32.mxu1 %v1790_v36 }
 0x35b   :  { %701 = vadd.xlane.f32.xlu1 %v1788_v33 }
 0x35c   :  { %695 = vadd.xlane.f32.xlu0 %v1776_v16 }
 0x35d   :  { %v1792_v37 = vpop.eup %1791 }
 0x35e   :  { %v1794_v38 = vpop.eup %1793  ;;  %1691 = vmatmul.mubr.f32.gmra.mrb[22].mxu1 %v1792_v37 }
 0x35f   :  { %1693 = vmatprep.mubr.f32.mxu1 %v1794_v38  ;;  %697 = vadd.xlane.f32.xlu1 %v1784_v28 }
 0x360   :  { %707 = vadd.xlane.f32.xlu0 %v1794_v38 }
 0x361   :  { %v1796_v42 = vpop.eup %1795 }
 0x362   :  { %1694 = vmatmul.mubr.f32.gmra.mrb[24].mxu1 %v1796_v42 }
 0x363   :  { %709 = vadd.xlane.f32.xlu1 %v1796_v42  ;;  %v884_v42 = vld [vmem:[%s2588_s8 + $0x60] sm:$0xff] }
 0x364   :  { %703 = vadd.xlane.f32.xlu0 %v1790_v36 }
 0x367   :  { %705 = vadd.xlane.f32.xlu1 %v1792_v37  ;;  %v886_v37 = vld [vmem:[%s2588_s8 + $0x70] sm:$0xff] }
 0x3d4   :  { %v2220_v44 = vpop.xlane.xlu0 %683 }
 0x3d5   :  { %v890_v45 = vmul.f32 %v874_v43, %v2220_v44  ;;  %1797 = vlog2.f32 %v2220_v44 }
 0x3d7   :  { %916 = vperm.xlu1 %1746, %v890_v45  }
 0x3d8   :  { %v2229_v51 = vpop.xlane.xlu1 %685  ;;  %v2231_v52 = vpop.xlane.xlu0 %679 }
 0x3d9   :  { %v891_v53 = vmul.f32 %v875_v47, %v2229_v51  ;;  %v888_v50 = vmul.f32 %v872_v49, %v2231_v52  ;;  %1799 = vlog2.f32 %v2231_v52 }
 0x3da   :  { %1801 = vlog2.f32 %v2229_v51 }
 0x3db   :  { %921 = vperm.xlu1 %1746, %v891_v53   ;;  %906 = vperm.xlu0 %1747, %v888_v50  }
 0x3dc   :  { %v2238_v55 = vpop.xlane.xlu1 %681  ;;  %v2240_v57 = vpop.xlane.xlu0 %691 }
 0x3dd   :  { %v889_v59 = vmul.f32 %v873_v56, %v2238_v55  ;;  %v894_v1 = vmul.f32 %v878_v61, %v2240_v57  ;;  %1803 = vlog2.f32 %v2238_v55 }
 0x3de   :  { %1805 = vlog2.f32 %v2240_v57 }
 0x3df   :  { %911 = vperm.xlu1 %1746, %v889_v59  }
 0x3e0   :  { %v2246_v62 = vpop.xlane.xlu1 %693 }
 0x3e1   :  { %v2252_v3 = vpop.xlane.xlu0 %687  ;;  %v895_v13 = vmul.f32 %v879_v7, %v2246_v62  ;;  %1807 = vlog2.f32 %v2246_v62 }
 0x3e2   :  { %v892_v6 = vmul.f32 %v876_v2, %v2252_v3  ;;  %1809 = vlog2.f32 %v2252_v3 }
 0x3e3   :  { %936 = vperm.xlu1 %1746, %v894_v1  }
 0x3e4   :  { %v2254_v5 = vpop.xlane.xlu1 %689 }
 0x3e5   :  { %v2263_v10 = vpop.xlane.xlu0 %699  ;;  %v893_v18 = vmul.f32 %v877_v15, %v2254_v5  ;;  %1811 = vlog2.f32 %v2254_v5 }
 0x3e6   :  { %v898_v27 = vmul.f32 %v882_v22, %v2263_v10  ;;  %1813 = vlog2.f32 %v2263_v10 }
 0x3e7   :  { %926 = vperm.xlu1 %1746, %v892_v6  }
 0x3e8   :  { %v2265_v12 = vpop.xlane.xlu1 %701 }
 0x3e9   :  { %v899_v14 = vmul.f32 %v883_v8, %v2265_v12  ;;  %v2282_v23 = vpop.xlane.xlu0 %695  ;;  %1815 = vlog2.f32 %v2265_v12 }
 0x3ea   :  { %v896_v34 = vmul.f32 %v880_v29, %v2282_v23  ;;  %1817 = vlog2.f32 %v2282_v23 }
 0x3eb   :  { %961 = vperm.xlu0 %1747, %v899_v14   ;;  %941 = vperm.xlu1 %1746, %v895_v13  }
 0x3ec   :  { %v2275_v16 = vpop.xlane.xlu1 %697 }
 0x3ed   :  { %v897_v19 = vmul.f32 %v881_v17, %v2275_v16  ;;  %v2297_v31 = vpop.xlane.xlu0 %707  ;;  %1819 = vlog2.f32 %v2275_v16 }
 0x3ee   :  { %v902_v38 = vmul.f32 %v886_v37, %v2297_v31 }
 0x3ef   :  { %951 = vperm.xlu0 %1747, %v897_v19   ;;  %931 = vperm.xlu1 %1746, %v893_v18  }
 0x3f0   :  { %v2287_v26 = vpop.xlane.xlu1 %709 }
 0x3f1   :  { %v903_v28 = vmul.f32 %v887_v24, %v2287_v26  ;;  %v2310_v43 = vpop.xlane.xlu0 %703 }
 0x3f2   :  { %v900_v45 = vmul.f32 %v884_v42, %v2310_v43  ;;  %1821 = vlog2.f32 %v2310_v43 }
 0x3f3   :  { %981 = vperm.xlu0 %1747, %v903_v28   ;;  %956 = vperm.xlu1 %1746, %v898_v27   ;;  %1823 = vlog2.f32 %v2297_v31 }
 0x3f4   :  { %v2299_v33 = vpop.xlane.xlu1 %705 }
 0x3f5   :  { %v901_v36 = vmul.f32 %v885_v30, %v2299_v33  ;;  %1825 = vlog2.f32 %v2299_v33 }
 0x3f6   :  { %1827 = vlog2.f32 %v2287_v26 }
 0x3f7   :  { %971 = vperm.xlu0 %1747, %v901_v36   ;;  %946 = vperm.xlu1 %1746, %v896_v34  }
 0x3fb   :  { %976 = vperm.xlu1 %1746, %v902_v38  }
 0x3ff   :  { %966 = vperm.xlu1 %1746, %v900_v45  }
 0x40e   :  { %v1674_v47 = vpop.f32.mrb[32].mxu0 }
 0x40f   :  { %v793_v49 = vpop.f32.mrb[33].mxu0 }
 0x416   :  { %v1683_v53 = vpop.f32.mrb[16].mxu1 }
 0x417   :  { %v823_v50 = vpop.f32.mrb[17].mxu1 }
 0x41f   :  { %v1677_v56 = vpop.f32.mrb[34].mxu0 }
 0x420   :  { %v803_v59 = vpop.f32.mrb[35].mxu0 }
 0x425   :  { %v2313_v61 = vpop.f32.mrb[18].mxu1 }
 0x426   :  { %v2315_v1 = vpop.f32.mrb[19].mxu1 }
 0x427   :  { %v2317_v2 = vpop.f32.mrb[36].mxu0 }
 0x428   :  { %v813_v6 = vpop.f32.mrb[37].mxu0 }
 0x429   :  { %v2319_v7 = vpop.f32.mrb[20].mxu1 }
 0x42a   :  { %v2321_v8 = vpop.f32.mrb[21].mxu1 }
 0x431   :  { %v2323_v13 = vpop.f32.mrb[22].mxu1 }
 0x432   :  { %v2325_v14 = vpop.f32.mrb[23].mxu1 }
 0x435   :  { %v2327_v15 = vpop.f32.mrb[24].mxu1 }
 0x436   :  { %v2329_v17 = vpop.f32.mrb[25].mxu1 }
 0x456   :  { %v917_v18 = vpop.permute.xlu1 %916 }
 0x457   :  { %vm986_vm2 = vcmp.lt.f32.partialorder %v803_v59, %v917_v18 }
 0x458   :  { %vm1002_vm3 = vmand %vm582_vm1, %vm986_vm2 }
 0x459   :  { %v1018_v19 = vsel %vm1002_vm3, 1, %v1829_v35 }
 0x45a   :  { %v922_v22 = vpop.permute.xlu1 %921  ;;  %v907_v24 = vpop.permute.xlu0 %906  ;;  %v1057_v27 = vshrl.u32 %v1018_v19, 16  ;;  %v1056_v29 = vand.u32 65535, %v1018_v19 }
 0x45b   :  { %vm987_vm4 = vcmp.lt.f32.partialorder %v1677_v56, %v922_v22  ;;  %vm984_vm5 = vcmp.lt.f32.partialorder %v793_v49, %v907_v24 }
 0x45c   :  { %vm1003_vm6 = vmand %vm582_vm1, %vm987_vm4  ;;  %v1059_v28 = vcvt.s32.f32 %v1057_v27  ;;  %v1058_v38 = vcvt.s32.f32 %v1056_v29 }
 0x45d   :  { %vm1000_vm7 = vmand %vm582_vm1, %vm984_vm5  ;;  %v1019_v30 = vsel %vm1003_vm6, 1, %v1829_v35 }
 0x45e   :  { %v1016_v34 = vsel %vm1000_vm7, 1, %v1829_v35  ;;  %v912_v36 = vpop.permute.xlu1 %911  ;;  %1062 = vadd.xlane.f32.xlu0 %v1059_v28  ;;  %v1069_v56 = vshrl.u32 %v1019_v30, 16  ;;  %v1068_v24 = vand.u32 65535, %v1019_v30 }
 0x45f   :  { %vm985_vm8 = vcmp.lt.f32.partialorder %v1674_v47, %v912_v36  ;;  %v1033_v37 = vshrl.u32 %v1016_v34, 16  ;;  %v1032_v42 = vand.u32 65535, %v1016_v34 }
 0x460   :  { %vm1001_vm9 = vmand %vm582_vm1, %vm985_vm8  ;;  %v1071_v22 = vcvt.s32.f32 %v1069_v56  ;;  %v1070_v34 = vcvt.s32.f32 %v1068_v24 }
 0x461   :  { %v1017_v45 = vsel %vm1001_vm9, 1, %v1829_v35  ;;  %v1035_v49 = vcvt.s32.f32 %v1033_v37  ;;  %v1034_v18 = vcvt.s32.f32 %v1032_v42 }
 0x462   :  { %1060 = vadd.xlane.f32.xlu0 %v1058_v38  ;;  %v937_v59 = vpop.permute.xlu1 %936  ;;  %v1045_v19 = vshrl.u32 %v1017_v45, 16  ;;  %v1044_v36 = vand.u32 65535, %v1017_v45 }
 0x463   :  { %vm990_vm10 = vcmp.lt.f32.partialorder %v823_v50, %v937_v59  ;;  %1038 = vadd.xlane.f32.xlu1 %v1035_v49 }
 0x464   :  { %vm1006_vm11 = vmand %vm582_vm1, %vm990_vm10  ;;  %v1047_v28 = vcvt.s32.f32 %v1045_v19  ;;  %v1046_v42 = vcvt.s32.f32 %v1044_v36 }
 0x465   :  { %v1022_v47 = vsel %vm1006_vm11, 1, %v1829_v35 }
 0x466   :  { %v927_v27 = vpop.permute.xlu1 %926  ;;  %1036 = vadd.xlane.f32.xlu0 %v1034_v18  ;;  %v1105_v29 = vshrl.u32 %v1022_v47, 16  ;;  %v1104_v30 = vand.u32 65535, %v1022_v47 }
 0x467   :  { %vm988_vm12 = vcmp.lt.f32.partialorder %v813_v6, %v927_v27  ;;  %1074 = vadd.xlane.f32.xlu1 %v1071_v22 }
 0x468   :  { %vm1004_vm13 = vmand %vm582_vm1, %vm988_vm12  ;;  %v1107_v37 = vcvt.s32.f32 %v1105_v29  ;;  %v1106_v56 = vcvt.s32.f32 %v1104_v30 }
 0x469   :  { %v1020_v38 = vsel %vm1004_vm13, 1, %v1829_v35 }
 0x46a   :  { %v942_v50 = vpop.permute.xlu1 %941  ;;  %1050 = vadd.xlane.f32.xlu0 %v1047_v28  ;;  %v1081_v59 = vshrl.u32 %v1020_v38, 16  ;;  %v962_v18 = vpop.permute.xlu0 %961  ;;  %v1080_v24 = vand.u32 65535, %v1020_v38 }
 0x46b   :  { %vm991_vm14 = vcmp.lt.f32.partialorder %v1683_v53, %v942_v50  ;;  %1072 = vadd.xlane.f32.xlu1 %v1070_v34  ;;  %vm995_vm4 = vcmp.lt.f32.partialorder %v2319_v7, %v962_v18 }
 0x46c   :  { %vm1007_vm15 = vmand %vm582_vm1, %vm991_vm14 }
 0x46d   :  { %v1023_v6 = vsel %vm1007_vm15, 1, %v1829_v35  ;;  %vm1011_vm6 = vmand %vm582_vm1, %vm995_vm4 }
 0x46e   :  { %v932_v49 = vpop.permute.xlu1 %931  ;;  %1110 = vadd.xlane.f32.xlu0 %v1107_v37  ;;  %v1117_v45 = vshrl.u32 %v1023_v6, 16  ;;  %v1116_v19 = vand.u32 65535, %v1023_v6  ;;  %v952_v7 = vpop.permute.xlu0 %951  ;;  %v1027_v30 = vsel %vm1011_vm6, 1, %v1829_v35 }
 0x46f   :  { %vm989_vm0 = vcmp.lt.f32.partialorder %v2317_v2, %v932_v49  ;;  %1048 = vadd.xlane.f32.xlu1 %v1046_v42  ;;  %v1083_v2 = vcvt.s32.f32 %v1081_v59  ;;  %vm993_vm9 = vcmp.lt.f32.partialorder %v2313_v61, %v952_v7 }
 0x470   :  { %vm1005_vm2 = vmand %vm582_vm1, %vm989_vm0  ;;  %v1119_v53 = vcvt.s32.f32 %v1117_v45  ;;  %v1118_v28 = vcvt.s32.f32 %v1116_v19  ;;  %v1165_v45 = vshrl.u32 %v1027_v30, 16 }
 0x471   :  { %v1021_v47 = vsel %vm1005_vm2, 1, %v1829_v35  ;;  %vm1009_vm10 = vmand %vm582_vm1, %vm993_vm9 }
 0x472   :  { %v957_v22 = vpop.permute.xlu1 %956  ;;  %1108 = vadd.xlane.f32.xlu0 %v1106_v56  ;;  %v1093_v29 = vshrl.u32 %v1021_v47, 16  ;;  %v1092_v37 = vand.u32 65535, %v1021_v47  ;;  %v1167_v19 = vcvt.s32.f32 %v1165_v45  ;;  %v1164_v47 = vand.u32 65535, %v1027_v30 }
 0x473   :  { %vm994_vm3 = vcmp.lt.f32.partialorder %v2321_v8, %v957_v22  ;;  %1122 = vadd.xlane.f32.xlu1 %v1119_v53  ;;  %v1082_v8 = vcvt.s32.f32 %v1080_v24  ;;  %v982_v53 = vpop.permute.xlu0 %981  ;;  %v1025_v61 = vsel %vm1009_vm10, 1, %v1829_v35 }
 0x474   :  { %vm1010_vm5 = vmand %vm582_vm1, %vm994_vm3  ;;  %v1095_v50 = vcvt.s32.f32 %v1093_v29  ;;  %v1094_v49 = vcvt.s32.f32 %v1092_v37  ;;  %vm999_vm14 = vcmp.lt.f32.partialorder %v2327_v15, %v982_v53 }
 0x475   :  { %v1026_v27 = vsel %vm1010_vm5, 1, %v1829_v35  ;;  %vm1015_vm0 = vmand %vm582_vm1, %vm999_vm14 }
 0x476   :  { %v947_v34 = vpop.permute.xlu1 %946  ;;  %1086 = vadd.xlane.f32.xlu0 %v1083_v2  ;;  %v1153_v36 = vshrl.u32 %v1026_v27, 16  ;;  %v1152_v42 = vand.u32 65535, %v1026_v27  ;;  %v1166_v27 = vcvt.s32.f32 %v1164_v47 }
 0x477   :  { %vm992_vm7 = vcmp.lt.f32.partialorder %v2315_v1, %v947_v34  ;;  %1120 = vadd.xlane.f32.xlu1 %v1118_v28  ;;  %v1141_v28 = vshrl.u32 %v1025_v61, 16 }
 0x478   :  { %vm1008_vm8 = vmand %vm582_vm1, %vm992_vm7  ;;  %v1155_v6 = vcvt.s32.f32 %v1153_v36  ;;  %v1154_v59 = vcvt.s32.f32 %v1152_v42  ;;  %v1031_v36 = vsel %vm1015_vm0, 1, %v1829_v35 }
 0x479   :  { %v1024_v1 = vsel %vm1008_vm8, 1, %v1829_v35  ;;  %v1143_v34 = vcvt.s32.f32 %v1141_v28  ;;  %v1213_v30 = vshrl.u32 %v1031_v36, 16 }
 0x47a   :  { %v977_v38 = vpop.permute.xlu1 %976  ;;  %1084 = vadd.xlane.f32.xlu0 %v1082_v8  ;;  %v1129_v18 = vshrl.u32 %v1024_v1, 16  ;;  %v1128_v2 = vand.u32 65535, %v1024_v1  ;;  %v1140_v8 = vand.u32 65535, %v1025_v61 }
 0x47b   :  { %1098 = vadd.xlane.f32.xlu1 %v1095_v50  ;;  %vm998_vm11 = vcmp.lt.f32.partialorder %v2329_v17, %v977_v38  ;;  %v972_v17 = vpop.permute.xlu0 %971  ;;  %v1215_v42 = vcvt.s32.f32 %v1213_v30 }
 0x47c   :  { %vm1014_vm12 = vmand %vm582_vm1, %vm998_vm11  ;;  %v1131_v22 = vcvt.s32.f32 %v1129_v18  ;;  %vm997_vm2 = vcmp.lt.f32.partialorder %v2323_v13, %v972_v17  ;;  %v1142_v37 = vcvt.s32.f32 %v1140_v8 }
 0x47d   :  { %v1030_v24 = vsel %vm1014_vm12, 1, %v1829_v35  ;;  %vm1013_vm3 = vmand %vm582_vm1, %vm997_vm2 }
 0x47e   :  { %1158 = vadd.xlane.f32.xlu0 %v1155_v6  ;;  %v967_v56 = vpop.permute.xlu1 %966  ;;  %v1201_v29 = vshrl.u32 %v1030_v24, 16  ;;  %v1029_v38 = vsel %vm1013_vm3, 1, %v1829_v35  ;;  %v1200_v45 = vand.u32 65535, %v1030_v24 }
 0x47f   :  { %1096 = vadd.xlane.f32.xlu1 %v1094_v49  ;;  %vm996_vm13 = vcmp.lt.f32.partialorder %v2325_v14, %v967_v56  ;;  %v1130_v14 = vcvt.s32.f32 %v1128_v2  ;;  %v1189_v1 = vshrl.u32 %v1029_v38, 16  ;;  %v1188_v56 = vand.u32 65535, %v1029_v38 }
 0x480   :  { %vm1012_vm15 = vmand %vm582_vm1, %vm996_vm13  ;;  %v1203_v7 = vcvt.s32.f32 %v1201_v29  ;;  %vm1400_vm1 = vcmask 7168  }
 0x481   :  { %v1028_v15 = vsel %vm1012_vm15, 1, %v1829_v35  ;;  %v1191_v53 = vcvt.s32.f32 %v1189_v1  ;;  %v1190_v18 = vcvt.s32.f32 %v1188_v56 }
 0x482   :  { %1156 = vadd.xlane.f32.xlu0 %v1154_v59  ;;  %v1177_v50 = vshrl.u32 %v1028_v15, 16  ;;  %v1176_v6 = vand.u32 65535, %v1028_v15  ;;  %v1202_v59 = vcvt.s32.f32 %v1200_v45 }
 0x483   :  { %1170 = vadd.xlane.f32.xlu1 %v1167_v19  ;;  %v1212_v19 = vand.u32 65535, %v1031_v36 }
 0x484   :  { %v1179_v13 = vcvt.s32.f32 %v1177_v50  ;;  %v1178_v49 = vcvt.s32.f32 %v1176_v6 }
 0x485   :  { %v1214_v35 = vcvt.s32.f32 %v1212_v19 }
 0x486   :  { %1134 = vadd.xlane.f32.xlu0 %v1131_v22 }
 0x487   :  { %1168 = vadd.xlane.f32.xlu1 %v1166_v27 }
 0x48a   :  { %1132 = vadd.xlane.f32.xlu0 %v1130_v14 }
 0x48b   :  { %1146 = vadd.xlane.f32.xlu1 %v1143_v34 }
 0x48e   :  { %1206 = vadd.xlane.f32.xlu0 %v1203_v7 }
 0x48f   :  { %1144 = vadd.xlane.f32.xlu1 %v1142_v37  ;;  %v1830_v37 = vmov 0.0  }
 0x492   :  { %1182 = vadd.xlane.f32.xlu0 %v1179_v13 }
 0x493   :  { %1218 = vadd.xlane.f32.xlu1 %v1215_v42 }
 0x496   :  { %1180 = vadd.xlane.f32.xlu0 %v1178_v49 }
 0x497   :  { %1194 = vadd.xlane.f32.xlu1 %v1191_v53 }
 0x49a   :  { %1204 = vadd.xlane.f32.xlu0 %v1202_v59 }
 0x49b   :  { %1192 = vadd.xlane.f32.xlu1 %v1190_v18 }
 0x49f   :  { %1216 = vadd.xlane.f32.xlu1 %v1214_v35 }
 0x4eb   :  { %v1063_v47 = vpop.xlane.xlu0 %1062 }
 0x4ec   :  { %v1065_v61 = vcvt.f32.s32 %v1063_v47 }
 0x4ee   :  { %v1066_v2 = vshll.u32 %v1065_v61, 16 }
 0x4ef   :  { %v1061_v22 = vpop.xlane.xlu0 %1060 }
 0x4f0   :  { %v1039_v17 = vpop.xlane.xlu1 %1038  ;;  %v1064_v27 = vcvt.f32.s32 %v1061_v22 }
 0x4f1   :  { %v1041_v28 = vcvt.f32.s32 %v1039_v17 }
 0x4f2   :  { %v1067_v14 = vadd.s32 %v1066_v2, %v1064_v27 }
 0x4f3   :  { %v1037_v24 = vpop.xlane.xlu0 %1036  ;;  %v1042_v29 = vshll.u32 %v1041_v28, 16 }
 0x4f4   :  { %vm1228_vm4 = vcmp.lt.s32.totalorder %v1067_v14, 7  ;;  %v1075_v15 = vpop.xlane.xlu1 %1074  ;;  %v1040_v34 = vcvt.f32.s32 %v1037_v24 }
 0x4f5   :  { %v1077_v8 = vcvt.f32.s32 %v1075_v15  ;;  %v1229_v36 = vsel %vm1228_vm4, %v1067_v14, 7 }
 0x4f6   :  { %v1043_v7 = vadd.s32 %v1042_v29, %v1040_v34  ;;  %vm1258_vm5 = vcmp.eq.s32.totalorder %v2023_v40, %v1229_v36  ;;  %1403 = vst.msk [vmem:[%s2589_s9 + $0x10] sm:$0xff] %vm1400_vm1, %v1229_v36 }
 0x4f7   :  { %v1051_v50 = vpop.xlane.xlu0 %1050  ;;  %v1471_v30 = vsel %vm1258_vm5, 1.0, %v1830_v37  ;;  %v1078_v6 = vshll.u32 %v1077_v8, 16 }
 0x4f8   :  { %vm1224_vm6 = vcmp.lt.s32.totalorder %v1043_v7, 7  ;;  %v1073_v38 = vpop.xlane.xlu1 %1072  ;;  %v1306_v13 = vmul.f32 %v1471_v30, %v2168_v54  ;;  %v1053_v1 = vcvt.f32.s32 %v1051_v50 }
 0x4f9   :  { %v1076_v42 = vcvt.f32.s32 %v1073_v38  ;;  %v1225_v49 = vsel %vm1224_vm6, %v1043_v7, 7 }
 0x4fa   :  { %1324 = vadd.xlane.f32.xlu0 %v1306_v13  ;;  %vm1256_vm7 = vcmp.eq.s32.totalorder %v2023_v40, %v1225_v49  ;;  %1401 = vst.msk [vmem:[%s2589_s9] sm:$0xff] %vm1400_vm1, %v1225_v49  ;;  %v1054_v19 = vshll.u32 %v1053_v1, 16 }
 0x4fb   :  { %v1079_v45 = vadd.s32 %v1078_v6, %v1076_v42  ;;  %v1111_v53 = vpop.xlane.xlu0 %1110  ;;  %v1469_v56 = vsel %vm1256_vm7, 1.0, %v1830_v37 }
 0x4fc   :  { %v1049_v59 = vpop.xlane.xlu1 %1048  ;;  %v1113_v18 = vcvt.f32.s32 %v1111_v53  ;;  %v1304_v54 = vmul.f32 %v1469_v56, %v2152_v39 }
 0x4fd   :  { %vm1230_vm8 = vcmp.lt.s32.totalorder %v1079_v45, 7  ;;  %v1052_v35 = vcvt.f32.s32 %v1049_v59 }
 0x4fe   :  { %1320 = vadd.xlane.f32.xlu0 %v1304_v54  ;;  %v1231_v47 = vsel %vm1230_vm8, %v1079_v45, 7  ;;  %v1114_v2 = vshll.u32 %v1113_v18, 16 }
 0x4ff   :  { %v1055_v61 = vadd.s32 %v1054_v19, %v1052_v35  ;;  %v1109_v22 = vpop.xlane.xlu0 %1108  ;;  %vm1259_vm9 = vcmp.eq.s32.totalorder %v2023_v40, %v1231_v47  ;;  %1404 = vst.msk [vmem:[%s2589_s9 + $0x18] sm:$0xff] %vm1400_vm1, %v1231_v47 }
 0x500   :  { %v1123_v17 = vpop.xlane.xlu1 %1122  ;;  %v1112_v27 = vcvt.f32.s32 %v1109_v22  ;;  %v1472_v28 = vsel %vm1259_vm9, 1.0, %v1830_v37 }
 0x501   :  { %vm1226_vm10 = vcmp.lt.s32.totalorder %v1055_v61, 7  ;;  %v1125_v39 = vcvt.f32.s32 %v1123_v17  ;;  %v1307_v14 = vmul.f32 %v1472_v28, %v2175_v60 }
 0x502   :  { %v1115_v24 = vadd.s32 %v1114_v2, %v1112_v27  ;;  %v1227_v29 = vsel %vm1226_vm10, %v1055_v61, 7 }
 0x503   :  { %1326 = vadd.xlane.f32.xlu1 %v1307_v14  ;;  %v1087_v15 = vpop.xlane.xlu0 %1086  ;;  %vm1257_vm11 = vcmp.eq.s32.totalorder %v2023_v40, %v1227_v29  ;;  %1402 = vst.msk [vmem:[%s2589_s9 + $0x8] sm:$0xff] %vm1400_vm1, %v1227_v29  ;;  %v1126_v7 = vshll.u32 %v1125_v39, 16 }
 0x504   :  { %vm1236_vm12 = vcmp.lt.s32.totalorder %v1115_v24, 7  ;;  %v1121_v34 = vpop.xlane.xlu1 %1120  ;;  %v1089_v8 = vcvt.f32.s32 %v1087_v15  ;;  %v1470_v36 = vsel %vm1257_vm11, 1.0, %v1830_v37 }
 0x505   :  { %v1124_v50 = vcvt.f32.s32 %v1121_v34  ;;  %v1305_v60 = vmul.f32 %v1470_v36, %v2156_v41  ;;  %v1237_v30 = vsel %vm1236_vm12, %v1115_v24, 7 }
 0x506   :  { %vm1262_vm13 = vcmp.eq.s32.totalorder %v2023_v40, %v1237_v30  ;;  %1407 = vst.msk [vmem:[%s2589_s9 + $0x30] sm:$0xff] %vm1400_vm1, %v1237_v30  ;;  %v1090_v42 = vshll.u32 %v1089_v8, 16 }
 0x507   :  { %v1127_v38 = vadd.s32 %v1126_v7, %v1124_v50  ;;  %1322 = vadd.xlane.f32.xlu1 %v1305_v60  ;;  %v1085_v13 = vpop.xlane.xlu0 %1084  ;;  %v1475_v6 = vsel %vm1262_vm13, 1.0, %v1830_v37 }
 0x508   :  { %v1099_v1 = vpop.xlane.xlu1 %1098  ;;  %v1088_v49 = vcvt.f32.s32 %v1085_v13  ;;  %v1310_v45 = vmul.f32 %v1475_v6, %v2160_v46 }
 0x509   :  { %vm1238_vm14 = vcmp.lt.s32.totalorder %v1127_v38, 7  ;;  %v1101_v41 = vcvt.f32.s32 %v1099_v1 }
 0x50a   :  { %v1091_v53 = vadd.s32 %v1090_v42, %v1088_v49  ;;  %1332 = vadd.xlane.f32.xlu0 %v1310_v45  ;;  %v1239_v56 = vsel %vm1238_vm14, %v1127_v38, 7 }
 0x50b   :  { %v1159_v59 = vpop.xlane.xlu0 %1158  ;;  %vm1263_vm15 = vcmp.eq.s32.totalorder %v2023_v40, %v1239_v56  ;;  %1408 = vst.msk [vmem:[%s2589_s9 + $0x38] sm:$0xff] %vm1400_vm1, %v1239_v56  ;;  %v1102_v35 = vshll.u32 %v1101_v41, 16 }
 0x50c   :  { %vm1232_vm0 = vcmp.lt.s32.totalorder %v1091_v53, 7  ;;  %v1097_v18 = vpop.xlane.xlu1 %1096  ;;  %v1161_v54 = vcvt.f32.s32 %v1159_v59  ;;  %v1476_v19 = vsel %vm1263_vm15, 1.0, %v1830_v37 }
 0x50d   :  { %v1100_v46 = vcvt.f32.s32 %v1097_v18  ;;  %v1311_v47 = vmul.f32 %v1476_v19, %v2164_v48  ;;  %v1233_v61 = vsel %vm1232_vm0, %v1091_v53, 7 }
 0x50e   :  { %vm1260_vm2 = vcmp.eq.s32.totalorder %v2023_v40, %v1233_v61  ;;  %1405 = vst.msk [vmem:[%s2589_s9 + $0x20] sm:$0xff] %vm1400_vm1, %v1233_v61  ;;  %v1162_v27 = vshll.u32 %v1161_v54, 16 }
 0x50f   :  { %v1103_v22 = vadd.s32 %v1102_v35, %v1100_v46  ;;  %1334 = vadd.xlane.f32.xlu1 %v1311_v47  ;;  %v1157_v2 = vpop.xlane.xlu0 %1156  ;;  %v1473_v17 = vsel %vm1260_vm2, 1.0, %v1830_v37 }
 0x510   :  { %v1171_v28 = vpop.xlane.xlu1 %1170  ;;  %v1160_v39 = vcvt.f32.s32 %v1157_v2  ;;  %v1308_v14 = vmul.f32 %v1473_v17, %v2183_v4 }
 0x511   :  { %vm1234_vm3 = vcmp.lt.s32.totalorder %v1103_v22, 7  ;;  %v1173_v48 = vcvt.f32.s32 %v1171_v28 }
 0x512   :  { %v1163_v24 = vadd.s32 %v1162_v27, %v1160_v39  ;;  %1328 = vadd.xlane.f32.xlu0 %v1308_v14  ;;  %v1235_v29 = vsel %vm1234_vm3, %v1103_v22, 7 }
 0x513   :  { %v1135_v15 = vpop.xlane.xlu0 %1134  ;;  %vm1261_vm4 = vcmp.eq.s32.totalorder %v2023_v40, %v1235_v29  ;;  %1406 = vst.msk [vmem:[%s2589_s9 + $0x28] sm:$0xff] %vm1400_vm1, %v1235_v29  ;;  %v1174_v7 = vshll.u32 %v1173_v48, 16 }
 0x514   :  { %vm1244_vm5 = vcmp.lt.s32.totalorder %v1163_v24, 7  ;;  %v1169_v34 = vpop.xlane.xlu1 %1168  ;;  %v1137_v8 = vcvt.f32.s32 %v1135_v15  ;;  %v1474_v36 = vsel %vm1261_vm4, 1.0, %v1830_v37 }
 0x515   :  { %v1172_v4 = vcvt.f32.s32 %v1169_v34  ;;  %v1309_v50 = vmul.f32 %v1474_v36, %v2194_v11  ;;  %v1245_v60 = vsel %vm1244_vm5, %v1163_v24, 7 }
 0x516   :  { %vm1266_vm6 = vcmp.eq.s32.totalorder %v2023_v40, %v1245_v60  ;;  %1411 = vst.msk [vmem:[%s2589_s9 + $0x50] sm:$0xff] %vm1400_vm1, %v1245_v60  ;;  %v1138_v6 = vshll.u32 %v1137_v8, 16 }
 0x517   :  { %v1175_v30 = vadd.s32 %v1174_v7, %v1172_v4  ;;  %1330 = vadd.xlane.f32.xlu1 %v1309_v50  ;;  %v1133_v38 = vpop.xlane.xlu0 %1132  ;;  %v1479_v13 = vsel %vm1266_vm6, 1.0, %v1830_v37 }
 0x518   :  { %v1147_v42 = vpop.xlane.xlu1 %1146  ;;  %v1136_v1 = vcvt.f32.s32 %v1133_v38  ;;  %v1314_v49 = vmul.f32 %v1479_v13, %v2179_v63 }
 0x519   :  { %vm1246_vm7 = vcmp.lt.s32.totalorder %v1175_v30, 7  ;;  %v1149_v11 = vcvt.f32.s32 %v1147_v42 }
 0x51a   :  { %v1139_v45 = vadd.s32 %v1138_v6, %v1136_v1  ;;  %1340 = vadd.xlane.f32.xlu0 %v1314_v49  ;;  %v1247_v41 = vsel %vm1246_vm7, %v1175_v30, 7 }
 0x51b   :  { %v1207_v53 = vpop.xlane.xlu0 %1206  ;;  %vm1267_vm8 = vcmp.eq.s32.totalorder %v2023_v40, %v1247_v41  ;;  %1412 = vst.msk [vmem:[%s2589_s9 + $0x58] sm:$0xff] %vm1400_vm1, %v1247_v41  ;;  %v1150_v18 = vshll.u32 %v1149_v11, 16 }
 0x51c   :  { %vm1240_vm9 = vcmp.lt.s32.totalorder %v1139_v45, 7  ;;  %v1145_v56 = vpop.xlane.xlu1 %1144  ;;  %v1480_v59 = vsel %vm1267_vm8, 1.0, %v1830_v37  ;;  %v1209_v27 = vcvt.f32.s32 %v1207_v53 }
 0x51d   :  { %v1148_v54 = vcvt.f32.s32 %v1145_v56  ;;  %v1315_v63 = vmul.f32 %v1480_v59, %v2188_v9  ;;  %v1241_v19 = vsel %vm1240_vm9, %v1139_v45, 7 }
 0x51e   :  { %vm1264_vm10 = vcmp.eq.s32.totalorder %v2023_v40, %v1241_v19  ;;  %1409 = vst.msk [vmem:[%s2589_s9 + $0x40] sm:$0xff] %vm1400_vm1, %v1241_v19  ;;  %v1210_v34 = vshll.u32 %v1209_v27, 16 }
 0x51f   :  { %v1151_v35 = vadd.s32 %v1150_v18, %v1148_v54  ;;  %1342 = vadd.xlane.f32.xlu1 %v1315_v63  ;;  %v1183_v46 = vpop.xlane.xlu0 %1182  ;;  %v1477_v47 = vsel %vm1264_vm10, 1.0, %v1830_v37 }
 0x520   :  { %v1219_v61 = vpop.xlane.xlu1 %1218  ;;  %v1185_v22 = vcvt.f32.s32 %v1183_v46  ;;  %v1312_v2 = vmul.f32 %v1477_v47, %v2172_v58 }
 0x521   :  { %vm1242_vm11 = vcmp.lt.s32.totalorder %v1151_v35, 7  ;;  %v1221_v7 = vcvt.f32.s32 %v1219_v61 }
 0x522   :  { %1336 = vadd.xlane.f32.xlu0 %v1312_v2  ;;  %v1243_v9 = vsel %vm1242_vm11, %v1151_v35, 7  ;;  %v1186_v28 = vshll.u32 %v1185_v22, 16 }
 0x523   :  { %v1181_v17 = vpop.xlane.xlu0 %1180  ;;  %vm1265_vm12 = vcmp.eq.s32.totalorder %v2023_v40, %v1243_v9  ;;  %1410 = vst.msk [vmem:[%s2589_s9 + $0x48] sm:$0xff] %vm1400_vm1, %v1243_v9  ;;  %v1222_v42 = vshll.u32 %v1221_v7, 16 }
 0x524   :  { %v1195_v39 = vpop.xlane.xlu1 %1194  ;;  %v1184_v14 = vcvt.f32.s32 %v1181_v17  ;;  %v1478_v48 = vsel %vm1265_vm12, 1.0, %v1830_v37 }
 0x525   :  { %v1197_v24 = vcvt.f32.s32 %v1195_v39  ;;  %v1313_v58 = vmul.f32 %v1478_v48, %v2191_v0 }
 0x526   :  { %v1187_v29 = vadd.s32 %v1186_v28, %v1184_v14 }
 0x527   :  { %1338 = vadd.xlane.f32.xlu1 %v1313_v58  ;;  %v1205_v15 = vpop.xlane.xlu0 %1204  ;;  %v1198_v4 = vshll.u32 %v1197_v24, 16 }
 0x528   :  { %vm1248_vm13 = vcmp.lt.s32.totalorder %v1187_v29, 7  ;;  %v1193_v8 = vpop.xlane.xlu1 %1192  ;;  %v1208_v36 = vcvt.f32.s32 %v1205_v15 }
 0x529   :  { %v1196_v50 = vcvt.f32.s32 %v1193_v8  ;;  %v1249_v60 = vsel %vm1248_vm13, %v1187_v29, 7 }
 0x52a   :  { %v1211_v30 = vadd.s32 %v1210_v34, %v1208_v36  ;;  %vm1268_vm14 = vcmp.eq.s32.totalorder %v2023_v40, %v1249_v60  ;;  %1413 = vst.msk [vmem:[%s2589_s9 + $0x60] sm:$0xff] %vm1400_vm1, %v1249_v60 }
 0x52b   :  { %v1199_v0 = vadd.s32 %v1198_v4, %v1196_v50  ;;  %v1481_v38 = vsel %vm1268_vm14, 1.0, %v1830_v37 }
 0x52c   :  { %vm1252_vm15 = vcmp.lt.s32.totalorder %v1211_v30, 7  ;;  %v1217_v13 = vpop.xlane.xlu1 %1216  ;;  %v1316_v6 = vmul.f32 %v1481_v38, %v2200_v20 }
 0x52d   :  { %vm1250_vm0 = vcmp.lt.s32.totalorder %v1199_v0, 7  ;;  %v1220_v1 = vcvt.f32.s32 %v1217_v13  ;;  %v1253_v49 = vsel %vm1252_vm15, %v1211_v30, 7 }
 0x52e   :  { %v1251_v11 = vsel %vm1250_vm0, %v1199_v0, 7  ;;  %1344 = vadd.xlane.f32.xlu0 %v1316_v6  ;;  %vm1270_vm2 = vcmp.eq.s32.totalorder %v2023_v40, %v1253_v49  ;;  %1415 = vst.msk [vmem:[%s2589_s9 + $0x70] sm:$0xff] %vm1400_vm1, %v1253_v49 }
 0x52f   :  { %vm1269_vm3 = vcmp.eq.s32.totalorder %v2023_v40, %v1251_v11  ;;  %1414 = vst.msk [vmem:[%s2589_s9 + $0x68] sm:$0xff] %vm1400_vm1, %v1251_v11  ;;  %v1223_v20 = vadd.s32 %v1222_v42, %v1220_v1  ;;  %v1483_v45 = vsel %vm1270_vm2, 1.0, %v1830_v37 }
 0x530   :  { %v1482_v41 = vsel %vm1269_vm3, 1.0, %v1830_v37  ;;  %v1318_v53 = vmul.f32 %v1483_v45, %v2203_v21  ;;  %v1798_v21 = vpop.eup %1797 }
 0x531   :  { %vm1254_vm4 = vcmp.lt.s32.totalorder %v1223_v20, 7  ;;  %v1317_v56 = vmul.f32 %v1482_v41, %v2207_v25  ;;  %v1800_v25 = vpop.eup %1799 }
 0x532   :  { %v1255_v59 = vsel %vm1254_vm4, %v1223_v20, 7  ;;  %1348 = vadd.xlane.f32.xlu0 %v1318_v53 }
 0x533   :  { %vm1271_vm5 = vcmp.eq.s32.totalorder %v2023_v40, %v1255_v59  ;;  %1416 = vst.msk [vmem:[%s2589_s9 + $0x78] sm:$0xff] %vm1400_vm1, %v1255_v59  ;;  %1346 = vadd.xlane.f32.xlu1 %v1317_v56  ;;  %v1357_v40 = vmul.f32 0.6931472, %v1798_v21 }
 0x534   :  { %v1484_v18 = vsel %vm1271_vm5, 1.0, %v1830_v37  ;;  %v1802_v37 = vpop.eup %1801 }
 0x535   :  { %v1319_v54 = vmul.f32 %v1484_v18, %v2212_v32  ;;  %v1353_v32 = vmul.f32 0.6931472, %v1800_v25  ;;  %v1359_v51 = vmul.f32 0.6931472, %v1802_v37  ;;  %v1804_v55 = vpop.eup %1803 }
 0x536   :  { %v1806_v46 = vpop.eup %1805  ;;  %v1355_v47 = vmul.f32 0.6931472, %v1804_v55 }
 0x537   :  { %1350 = vadd.xlane.f32.xlu1 %v1319_v54  ;;  %v1365_v22 = vmul.f32 0.6931472, %v1806_v46  ;;  %v1808_v3 = vpop.eup %1807 }
 0x538   :  { %v1810_v17 = vpop.eup %1809  ;;  %v1367_v27 = vmul.f32 0.6931472, %v1808_v3 }
 0x539   :  { %v1361_v39 = vmul.f32 0.6931472, %v1810_v17  ;;  %v1812_v48 = vpop.eup %1811 }
 0x53a   :  { %v1814_v24 = vpop.eup %1813  ;;  %v1363_v58 = vmul.f32 0.6931472, %v1812_v48 }
 0x53b   :  { %v1373_v15 = vmul.f32 0.6931472, %v1814_v24  ;;  %v1816_v8 = vpop.eup %1815 }
 0x53c   :  { %v1818_v36 = vpop.eup %1817  ;;  %v1375_v7 = vmul.f32 0.6931472, %v1816_v8 }
 0x53d   :  { %v1369_v50 = vmul.f32 0.6931472, %v1818_v36  ;;  %v1820_v30 = vpop.eup %1819 }
 0x53e   :  { %v1371_v43 = vmul.f32 0.6931472, %v1820_v30  ;;  %v1822_v6 = vpop.eup %1821 }
 0x53f   :  { %v1377_v42 = vmul.f32 0.6931472, %v1822_v6  ;;  %v1824_v31 = vpop.eup %1823 }
 0x540   :  { %v1826_v33 = vpop.eup %1825  ;;  %v1381_v11 = vmul.f32 0.6931472, %v1824_v31 }
 0x541   :  { %v1379_v20 = vmul.f32 0.6931472, %v1826_v33  ;;  %v1828_v26 = vpop.eup %1827 }
 0x542   :  { %v1383_v59 = vmul.f32 0.6931472, %v1828_v26 }
 0x587   :  { %v1325_v63 = vpop.xlane.xlu0 %1324 }
 0x588   :  { %v1386_v19 = vsub.f32 %v1325_v63, %v1357_v40 }
 0x58a   :  { %1419 = vst.msk [vmem:[%s2590_s10 + $0x10] sm:$0xff] %vm1400_vm1, %v1386_v19 }
 0x58b   :  { %v1321_v44 = vpop.xlane.xlu0 %1320 }
 0x58c   :  { %v1384_v52 = vsub.f32 %v1321_v44, %v1353_v32 }
 0x58e   :  { %1417 = vst.msk [vmem:[%s2590_s10] sm:$0xff] %vm1400_vm1, %v1384_v52 }
 0x590   :  { %v1327_v35 = vpop.xlane.xlu1 %1326 }
 0x591   :  { %v1387_v57 = vsub.f32 %v1327_v35, %v1359_v51 }
 0x593   :  { %1420 = vst.msk [vmem:[%s2590_s10 + $0x18] sm:$0xff] %vm1400_vm1, %v1387_v57 }
 0x594   :  { %v1323_v61 = vpop.xlane.xlu1 %1322 }
 0x595   :  { %v1385_v62 = vsub.f32 %v1323_v61, %v1355_v47 }
 0x597   :  { %1418 = vst.msk [vmem:[%s2590_s10 + $0x8] sm:$0xff] %vm1400_vm1, %v1385_v62  ;;  %v1333_v2 = vpop.xlane.xlu0 %1332 }
 0x598   :  { %v1390_v9 = vsub.f32 %v1333_v2, %v1365_v22 }
 0x59a   :  { %1423 = vst.msk [vmem:[%s2590_s10 + $0x30] sm:$0xff] %vm1400_vm1, %v1390_v9 }
 0x59c   :  { %v1335_v28 = vpop.xlane.xlu1 %1334 }
 0x59d   :  { %v1391_v5 = vsub.f32 %v1335_v28, %v1367_v27 }
 0x59f   :  { %1424 = vst.msk [vmem:[%s2590_s10 + $0x38] sm:$0xff] %vm1400_vm1, %v1391_v5  ;;  %v1329_v14 = vpop.xlane.xlu0 %1328 }
 0x5a0   :  { %v1388_v10 = vsub.f32 %v1329_v14, %v1361_v39 }
 0x5a2   :  { %1421 = vst.msk [vmem:[%s2590_s10 + $0x20] sm:$0xff] %vm1400_vm1, %v1388_v10 }
 0x5a4   :  { %v1331_v29 = vpop.xlane.xlu1 %1330 }
 0x5a5   :  { %v1389_v12 = vsub.f32 %v1331_v29, %v1363_v58 }
 0x5a7   :  { %1422 = vst.msk [vmem:[%s2590_s10 + $0x28] sm:$0xff] %vm1400_vm1, %v1389_v12  ;;  %v1341_v34 = vpop.xlane.xlu0 %1340 }
 0x5a8   :  { %v1394_v23 = vsub.f32 %v1341_v34, %v1373_v15 }
 0x5aa   :  { %1427 = vst.msk [vmem:[%s2590_s10 + $0x50] sm:$0xff] %vm1400_vm1, %v1394_v23 }
 0x5ac   :  { %v1343_v4 = vpop.xlane.xlu1 %1342 }
 0x5ad   :  { %v1395_v16 = vsub.f32 %v1343_v4, %v1375_v7 }
 0x5af   :  { %1428 = vst.msk [vmem:[%s2590_s10 + $0x58] sm:$0xff] %vm1400_vm1, %v1395_v16  ;;  %v1337_v60 = vpop.xlane.xlu0 %1336 }
 0x5b0   :  { %v1392_v0 = vsub.f32 %v1337_v60, %v1369_v50 }
 0x5b2   :  { %1425 = vst.msk [vmem:[%s2590_s10 + $0x40] sm:$0xff] %vm1400_vm1, %v1392_v0 }
 0x5b4   :  { %v1339_v38 = vpop.xlane.xlu1 %1338 }
 0x5b5   :  { %v1393_v13 = vsub.f32 %v1339_v38, %v1371_v43 }
 0x5b7   :  { %1426 = vst.msk [vmem:[%s2590_s10 + $0x48] sm:$0xff] %vm1400_vm1, %v1393_v13 }
 0x5bb   :  { %v1345_v1 = vpop.xlane.xlu0 %1344 }
 0x5bc   :  { %v1396_v49 = vsub.f32 %v1345_v1, %v1377_v42 }
 0x5be   :  { %1429 = vst.msk [vmem:[%s2590_s10 + $0x60] sm:$0xff] %vm1400_vm1, %v1396_v49 }
 0x5bf   :  { %v1349_v45 = vpop.xlane.xlu0 %1348 }
 0x5c0   :  { %v1347_v41 = vpop.xlane.xlu1 %1346  ;;  %v1398_v53 = vsub.f32 %v1349_v45, %v1381_v11 }
 0x5c1   :  { %v1397_v56 = vsub.f32 %v1347_v41, %v1379_v20 }
 0x5c2   :  { %1431 = vst.msk [vmem:[%s2590_s10 + $0x70] sm:$0xff] %vm1400_vm1, %v1398_v53 }
 0x5c3   :  { %1430 = vst.msk [vmem:[%s2590_s10 + $0x68] sm:$0xff] %vm1400_vm1, %v1397_v56 }
 0x5c4   :  { %v1351_v18 = vpop.xlane.xlu1 %1350 }
 0x5c5   :  { %v1399_v54 = vsub.f32 %v1351_v18, %v1383_v59 }
 0x5c7   :  { %1432 = vst.msk [vmem:[%s2590_s10 + $0x78] sm:$0xff] %vm1400_vm1, %v1399_v54 }

</bundles_post_ra>
